<compile_context>
chip_gen: v7x
topology: tpu7x:2x2x1
jax: 0.10.0
libtpu: 0.0.40
codegen_flags: <defaults>
</compile_context>

<pallas_src>
import numpy as np
import jax
import jax.numpy as jnp
from jax.experimental import pallas as pl
from jax.experimental.pallas import tpu as pltpu

BN_EPS = 1e-5

# ConvT(k=4, s=2, p=1) subpixel-phase tables: output parity (oy % 2) ->
# (kernel taps kh, input offsets dy).  Same tables apply to the width axis.
KOFF = ((1, 3), (2, 0))
DOFF = ((0, -1), (0, 1))


# ---------------------------------------------------------------------------
# Fused kernel: one full branch (5 dconv_bn_relu layers) per grid step.
# Activations: (channels, lanes) with lanes = flattened (batch, y, x) in the
# bases encoded by the constant shift / permutation matrices (_make_consts).
# ---------------------------------------------------------------------------
def _generator_kernel(xk_ref, w1_ref, s1_ref, w2_ref, s2_ref, w3_ref, s3_ref,
                      w4_ref, s4_ref, w5_ref, s5_ref, sm4_ref, sm8_ref,
                      perm_ref, o_ref):

    def mm(a, b):
        return jnp.dot(a, b, preferred_element_type=jnp.float32)

    def bn_relu(y, s_ref):
        # folded eval-BN/bias shift (f32, per output-channel row) + ReLU.
        return jnp.maximum(y + s_ref[0], 0.0).astype(jnp.bfloat16)

    def conv_t2(a, w_ref, s_ref, sm_ref):
        # ConvTranspose2d(k=4, s=2, p=1) via 4-phase subpixel decomposition.
        # a: (Ci, L) bf16.  sm_ref: (9, L, L) constant 0/1 "shift with zero
        # boundary" matrices in a's lane basis.  Returns (Co, 4L) bf16 with
        # the 4 output phases concatenated along lanes.
        shifted = {}
        for dy in (-1, 0, 1):
            for dx in (-1, 0, 1):
                if dy == 0 and dx == 0:
                    shifted[(dy, dx)] = a
                else:
                    d = (dy + 1) * 3 + (dx + 1)
                    shifted[(dy, dx)] = mm(a, sm_ref[d]).astype(jnp.bfloat16)
        outs = []
        for py in range(2):
            for px in range(2):
                taps = jnp.concatenate(
                    [shifted[(DOFF[py][j], DOFF[px][i])]
                     for j in range(2) for i in range(2)],
                    axis=0)                                    # (4*Ci, L)
                outs.append(bn_relu(mm(w_ref[0, py * 2 + px], taps), s_ref))
        return jnp.concatenate(outs, axis=1)                   # (Co, 4*L)

    # L1: ConvT(k=4, s=1, p=0) on the 1x1 input, as one block-diag matmul.
    a = bn_relu(mm(w1_ref[0], xk_ref[...]), s1_ref)            # (4d, 16N)
    # L2: ConvT(k=1) == pointwise channel mix.
    a = bn_relu(mm(w2_ref[0], a), s2_ref)                      # (4d, 16N)
    # TODO(synk): Dropout(p=0.4) treated as eval-mode identity (no RNG mask).
    # L3: ConvT(k=4, s=2, p=1): 4x4 -> 8x8 (phase-separated lanes).
    a = conv_t2(a, w3_ref, s3_ref, sm4_ref)                    # (2d, 64N)
    # L4: pointwise.
    a = bn_relu(mm(w4_ref[0], a), s4_ref)                      # (2d, 64N)
    # L5: ConvT(k=4, s=2, p=1): 8x8 -> 16x16 (phase-separated).
    a = conv_t2(a, w5_ref, s5_ref, sm8_ref)                    # (d, 256N)
    # Final constant permutation -> lanes = n-major, (Y*16 + X) within each n,
    # i.e. PyTorch's Flatten order once channels become the 2nd-to-last dim.
    y = mm(a, perm_ref[...])                                   # (d, 256N) f32
    batch = o_ref.shape[0]
    parts = [y[None, None, :, n * 256:(n + 1) * 256] for n in range(batch)]
    o_ref[...] = jnp.concatenate(parts, axis=0).astype(o_ref.dtype)


# ---------------------------------------------------------------------------
# pallas_call wrapper
# ---------------------------------------------------------------------------
def _shared_spec(arr):
    zeros = (0,) * arr.ndim
    return pl.BlockSpec(arr.shape, lambda g: zeros)


def _branch_spec(arr):
    rest = (0,) * (arr.ndim - 1)
    return pl.BlockSpec((1,) + arr.shape[1:], lambda g: (g,) + rest)


@jax.jit
def generator_forward(z, c, params):
    (w1, s1, w2, s2, w3, s3, w4, s4, w5, s5, sm4, sm8, perm) = params
    n = z.shape[0]
    d = w5.shape[2]                                    # = dim
    x = jnp.concatenate([z, c], axis=1)                # (N, z+c)
    # Layer-1 operand: block-diagonal expansion kron(I_16, x^T), so the
    # ConvT(k=4) on a 1x1 input is one matmul producing the (C, n*h*w) layout.
    xk = jnp.kron(jnp.eye(16, dtype=x.dtype), x.T).astype(jnp.bfloat16)

    branch_args = (w1, s1, w2, s2, w3, s3, w4, s4, w5, s5)
    out = pl.pallas_call(
        _generator_kernel,
        out_shape=jax.ShapeDtypeStruct((n, 3, d, 256), jnp.float32),
        grid_spec=pltpu.PrefetchScalarGridSpec(
            num_scalar_prefetch=0,
            grid=(3,),
            in_specs=([_shared_spec(xk)]
                      + [_branch_spec(a) for a in branch_args]
                      + [_shared_spec(sm4), _shared_spec(sm8),
                         _shared_spec(perm)]),
            out_specs=pl.BlockSpec((n, 1, d, 256), lambda g: (0, g, 0, 0)),
        ),
        compiler_params=pltpu.CompilerParams(
            dimension_semantics=("parallel",)),
    )(xk, *branch_args, sm4, sm8, perm)
    # (N, branch, C, H*W) -> (N, 3*C*H*W): contiguous reshape, already in
    # PyTorch's cat([flatten1, flatten2, flatten3], dim=1) order.
    return out.reshape(n, -1)


# ---------------------------------------------------------------------------
# Parameter init: synthetic deterministic weights + eval-mode BN stats.
# All layout transforms / BN folding are done here (init time), not per call.
# ---------------------------------------------------------------------------
def _raw_layer(key, cin, cout, ksize):
    kw_, kb, kg, kbe, km, kv = jax.random.split(key, 6)
    return dict(
        W=0.05 * jax.random.normal(kw_, (cin, cout, ksize, ksize), jnp.float32),
        bias=0.05 * jax.random.normal(kb, (cout,), jnp.float32),
        gamma=1.0 + 0.1 * jax.random.normal(kg, (cout,), jnp.float32),
        beta=0.1 * jax.random.normal(kbe, (cout,), jnp.float32),
        mean=0.1 * jax.random.normal(km, (cout,), jnp.float32),
        var=0.5 + jnp.abs(jax.random.normal(kv, (cout,), jnp.float32)),
    )


def _fold(lay):
    # y = conv(x)+bias; BN eval -> y*scale + shift  (scale folded into W).
    scale = lay["gamma"] / jnp.sqrt(lay["var"] + BN_EPS)
    shift = lay["beta"] + (lay["bias"] - lay["mean"]) * scale
    return lay["W"], scale, shift


def _pack_l1(layers):
    ws, ss = [], []
    for lay in layers:
        W, scale, shift = _fold(lay)
        cin, cout = W.shape[0], W.shape[1]
        # w[co, (h*4+w)*cin + ci] = W[ci, co, h, w] * scale[co]
        w = jnp.transpose(W, (1, 2, 3, 0)).reshape(cout, 16 * cin)
        ws.append(w * scale[:, None])
        ss.append(shift[:, None])
    return jnp.stack(ws).astype(jnp.bfloat16), jnp.stack(ss)


def _pack_1x1(layers):
    ws, ss = [], []
    for lay in layers:
        W, scale, shift = _fold(lay)
        ws.append(W[:, :, 0, 0].T * scale[:, None])
        ss.append(shift[:, None])
    return jnp.stack(ws).astype(jnp.bfloat16), jnp.stack(ss)


def _pack_s2(layers):
    ws, ss = [], []
    for lay in layers:
        W, scale, shift = _fold(lay)
        phases = []
        for py in range(2):
            for px in range(2):
                blocks = [W[:, :, KOFF[py][j], KOFF[px][i]].T   # (Co, Ci)
                          for j in range(2) for i in range(2)]
                phases.append(jnp.concatenate(blocks, axis=1) * scale[:, None])
        ws.append(jnp.stack(phases))                            # (4, Co, 4Ci)
        ss.append(shift[:, None])
    return jnp.stack(ws).astype(jnp.bfloat16), jnp.stack(ss)


def _make_consts(batch):
    """Constant 0/1 matrices encoding all spatial plumbing: tap shifts with
    zero boundaries for the two stride-2 layers and the final phase
    interleave + NCHW-flatten permutation."""
    def lam4(n, y, x):                 # 4x4 stage lane basis (16*batch lanes)
        return (y * 4 + x) * batch + n

    def lam8(n, y, x):                 # 8x8 stage, phase-separated (64*batch)
        return ((y % 2) * 2 + (x % 2)) * 16 * batch + lam4(n, y // 2, x // 2)

    def lam16(n, y, x):                # 16x16 stage, phase-separated (256*batch)
        return ((y % 2) * 2 + (x % 2)) * 64 * batch + lam8(n, y // 2, x // 2)

    def shift_mats(h, lam, lanes):
        m = np.zeros((9, lanes, lanes), np.float32)
        for dy in (-1, 0, 1):
            for dx in (-1, 0, 1):
                d = (dy + 1) * 3 + (dx + 1)
                for n in range(batch):
                    for y in range(h):
                        for x in range(h):
                            sy, sx = y + dy, x + dx
                            if 0 <= sy < h and 0 <= sx < h:
                                m[d, lam(n, sy, sx), lam(n, y, x)] = 1.0
        return m

    sm4 = shift_mats(4, lam4, 16 * batch)
    sm8 = shift_mats(8, lam8, 64 * batch)
    perm = np.zeros((256 * batch, 256 * batch), np.float32)
    for n in range(batch):
        for y in range(16):
            for x in range(16):
                perm[lam16(n, y, x), n * 256 + y * 16 + x] = 1.0
    return (jnp.asarray(sm4, jnp.bfloat16), jnp.asarray(sm8, jnp.bfloat16),
            jnp.asarray(perm, jnp.bfloat16))


def init_generator(key, z_dim, c_dim, dim, batch):
    cfg = [
        (z_dim + c_dim, 4 * dim, 4),   # dconv_bn_relu(z+c, 4d, 4, 1, 0)
        (4 * dim, 4 * dim, 1),         # dconv_bn_relu(4d, 4d, 1, 1, 0)
        (4 * dim, 2 * dim, 4),         # dconv_bn_relu(4d, 2d, 4, 2, 1)
        (2 * dim, 2 * dim, 1),         # dconv_bn_relu(2d, 2d, 1, 1, 0)
        (2 * dim, dim, 4),             # dconv_bn_relu(2d, d, 4, 2, 1)
    ]
    raws = []
    for bk in jax.random.split(key, 3):
        lkeys = jax.random.split(bk, len(cfg))
        raws.append([_raw_layer(k, ci, co, ks)
                     for k, (ci, co, ks) in zip(lkeys, cfg)])
    per_layer = list(zip(*raws))
    w1, s1 = _pack_l1(per_layer[0])
    w2, s2 = _pack_1x1(per_layer[1])
    w3, s3 = _pack_s2(per_layer[2])
    w4, s4 = _pack_1x1(per_layer[3])
    w5, s5 = _pack_s2(per_layer[4])
    sm4, sm8, perm = _make_consts(batch)
    params = (w1, s1, w2, s2, w3, s3, w4, s4, w5, s5, sm4, sm8, perm)
    return params, raws


# ---------------------------------------------------------------------------
# Pure numpy reference (PyTorch ConvTranspose2d / eval BN semantics).
# ---------------------------------------------------------------------------
def _convT_ref(x, W, stride, pad):
    n, _, h, _ = x.shape
    k = W.shape[-1]
    ho = (h - 1) * stride - 2 * pad + k
    out = np.zeros((n, W.shape[1], ho, ho), np.float32)
    for iy in range(h):
        for ix in range(h):
            for kh in range(k):
                for kw in range(k):
                    oy = iy * stride - pad + kh
                    ox = ix * stride - pad + kw
                    if 0 <= oy < ho and 0 <= ox < ho:
                        out[:, :, oy, ox] += np.einsum(
                            'ni,io->no', x[:, :, iy, ix], W[:, :, kh, kw])
    return out


def reference_forward(z, c, raws):
    x = np.concatenate([np.asarray(z), np.asarray(c)], 1).astype(np.float32)
    strides, pads = (1, 1, 2, 1, 2), (0, 0, 1, 0, 1)
    outs = []
    for branch in raws:
        h = x[:, :, None, None]
        for lay, s, p in zip(branch, strides, pads):
            W = np.asarray(lay["W"], np.float32)
            h = _convT_ref(h, W, s, p) + np.asarray(lay["bias"])[None, :, None, None]
            h = ((h - np.asarray(lay["mean"])[None, :, None, None])
                 / np.sqrt(np.asarray(lay["var"])[None, :, None, None] + BN_EPS)
                 * np.asarray(lay["gamma"])[None, :, None, None]
                 + np.asarray(lay["beta"])[None, :, None, None])
            h = np.maximum(h, 0.0)
        outs.append(h.reshape(h.shape[0], -1))
    return np.concatenate(outs, axis=1)


if __name__ == "__main__":
    batch, z_dim, c_dim, dim = 2, 8, 8, 8
    key = jax.random.PRNGKey(0)
    kz, kc, kp = jax.random.split(key, 3)
    z = jax.random.normal(kz, (batch, z_dim), jnp.float32)
    c = jax.random.normal(kc, (batch, c_dim), jnp.float32)
    params, raws = init_generator(kp, z_dim, c_dim, dim, batch)

    out = jax.block_until_ready(generator_forward(z, c, params))
    assert out.shape == (batch, 3 * dim * 16 * 16), out.shape
    assert bool(jnp.all(jnp.isfinite(out)))

    ref = reference_forward(z, c, raws)
    outn = np.asarray(out, np.float32)
    assert np.allclose(outn, ref, atol=5e-2, rtol=5e-2), (
        "max abs err vs reference: %g" % float(np.max(np.abs(outn - ref))))
    print("KERNEL_OK")
</pallas_src>

<mosaic_0001>
module attributes {stable_mosaic.version = 11 : i64} {
  func.func @_generator_kernel(%arg0: i32, %arg1: memref<256x32xbf16, #tpu.memory_space<vmem>>, %arg2: memref<1x32x256xbf16, #tpu.memory_space<vmem>>, %arg3: memref<1x32x1xf32, #tpu.memory_space<vmem>>, %arg4: memref<1x32x32xbf16, #tpu.memory_space<vmem>>, %arg5: memref<1x32x1xf32, #tpu.memory_space<vmem>>, %arg6: memref<1x4x16x128xbf16, #tpu.memory_space<vmem>>, %arg7: memref<1x16x1xf32, #tpu.memory_space<vmem>>, %arg8: memref<1x16x16xbf16, #tpu.memory_space<vmem>>, %arg9: memref<1x16x1xf32, #tpu.memory_space<vmem>>, %arg10: memref<1x4x8x64xbf16, #tpu.memory_space<vmem>>, %arg11: memref<1x8x1xf32, #tpu.memory_space<vmem>>, %arg12: memref<9x32x32xbf16, #tpu.memory_space<vmem>>, %arg13: memref<9x128x128xbf16, #tpu.memory_space<vmem>>, %arg14: memref<512x512xbf16, #tpu.memory_space<vmem>>, %arg15: memref<2x1x8x256xf32, #tpu.memory_space<vmem>>) attributes {dimension_semantics = [#tpu.dimension_semantics<parallel>], iteration_bounds = array<i64: 3>, scalar_prefetch = 0 : i64, scratch_operands = 0 : i64, tpu.core_type = #tpu.core_type<tc>, window_params = [{pipeline_mode = #tpu.pipeline_mode<synchronous>, transform_indices = @transform_0, window_bounds = array<i64: 256, 32>}, {transform_indices = @transform_1, window_bounds = array<i64: 1, 32, 256>}, {transform_indices = @transform_2, window_bounds = array<i64: 1, 32, 1>}, {transform_indices = @transform_3, window_bounds = array<i64: 1, 32, 32>}, {transform_indices = @transform_4, window_bounds = array<i64: 1, 32, 1>}, {transform_indices = @transform_5, window_bounds = array<i64: 1, 4, 16, 128>}, {transform_indices = @transform_6, window_bounds = array<i64: 1, 16, 1>}, {transform_indices = @transform_7, window_bounds = array<i64: 1, 16, 16>}, {transform_indices = @transform_8, window_bounds = array<i64: 1, 16, 1>}, {transform_indices = @transform_9, window_bounds = array<i64: 1, 4, 8, 64>}, {transform_indices = @transform_10, window_bounds = array<i64: 1, 8, 1>}, {pipeline_mode = #tpu.pipeline_mode<synchronous>, transform_indices = @transform_11, window_bounds = array<i64: 9, 32, 32>}, {pipeline_mode = #tpu.pipeline_mode<synchronous>, transform_indices = @transform_12, window_bounds = array<i64: 9, 128, 128>}, {pipeline_mode = #tpu.pipeline_mode<synchronous>, transform_indices = @transform_13, window_bounds = array<i64: 512, 512>}, {transform_indices = @transform_14, window_bounds = array<i64: 2, 1, 8, 256>}]} {
    %c0 = arith.constant 0 : index
    %c0_0 = arith.constant 0 : index
    %c0_1 = arith.constant 0 : index
    %0 = vector.load %arg2[%c0, %c0_0, %c0_1] : memref<1x32x256xbf16, #tpu.memory_space<vmem>>, vector<1x32x256xbf16>
    %1 = vector.shape_cast %0 : vector<1x32x256xbf16> to vector<32x256xbf16>
    %c0_2 = arith.constant 0 : index
    %c0_3 = arith.constant 0 : index
    %2 = vector.load %arg1[%c0_2, %c0_3] : memref<256x32xbf16, #tpu.memory_space<vmem>>, vector<256x32xbf16>
    %cst = arith.constant dense<0.000000e+00> : vector<32x32xf32>
    %3 = tpu.matmul %1, %2, %cst {dimension_numbers = #tpu.dot_dimension_numbers<[1], [0], [0], [1], [0, 0, 1, 1], [], []>} : vector<32x256xbf16>, vector<256x32xbf16>, vector<32x32xf32> -> vector<32x32xf32>
    %c0_4 = arith.constant 0 : index
    %c0_5 = arith.constant 0 : index
    %c0_6 = arith.constant 0 : index
    %4 = vector.load %arg3[%c0_4, %c0_5, %c0_6] : memref<1x32x1xf32, #tpu.memory_space<vmem>>, vector<1x32x1xf32>
    %5 = vector.shape_cast %4 : vector<1x32x1xf32> to vector<32x1xf32>
    %6 = vector.broadcast %5 : vector<32x1xf32> to vector<32x32xf32>
    %7 = arith.addf %3, %6 : vector<32x32xf32>
    %cst_7 = arith.constant 0.000000e+00 : f32
    %8 = vector.broadcast %cst_7 : f32 to vector<32x32xf32>
    %9 = arith.maximumf %7, %8 : vector<32x32xf32>
    %10 = arith.truncf %9 : vector<32x32xf32> to vector<32x32xbf16>
    %c0_8 = arith.constant 0 : index
    %c0_9 = arith.constant 0 : index
    %c0_10 = arith.constant 0 : index
    %11 = vector.load %arg4[%c0_8, %c0_9, %c0_10] : memref<1x32x32xbf16, #tpu.memory_space<vmem>>, vector<1x32x32xbf16>
    %12 = vector.shape_cast %11 : vector<1x32x32xbf16> to vector<32x32xbf16>
    %cst_11 = arith.constant dense<0.000000e+00> : vector<32x32xf32>
    %13 = tpu.matmul %12, %10, %cst_11 {dimension_numbers = #tpu.dot_dimension_numbers<[1], [0], [0], [1], [0, 0, 1, 1], [], []>} : vector<32x32xbf16>, vector<32x32xbf16>, vector<32x32xf32> -> vector<32x32xf32>
    %c0_12 = arith.constant 0 : index
    %c0_13 = arith.constant 0 : index
    %c0_14 = arith.constant 0 : index
    %14 = vector.load %arg5[%c0_12, %c0_13, %c0_14] : memref<1x32x1xf32, #tpu.memory_space<vmem>>, vector<1x32x1xf32>
    %15 = vector.shape_cast %14 : vector<1x32x1xf32> to vector<32x1xf32>
    %16 = vector.broadcast %15 : vector<32x1xf32> to vector<32x32xf32>
    %17 = arith.addf %13, %16 : vector<32x32xf32>
    %cst_15 = arith.constant 0.000000e+00 : f32
    %18 = vector.broadcast %cst_15 : f32 to vector<32x32xf32>
    %19 = arith.maximumf %17, %18 : vector<32x32xf32>
    %20 = arith.truncf %19 : vector<32x32xf32> to vector<32x32xbf16>
    %c0_16 = arith.constant 0 : index
    %c0_17 = arith.constant 0 : index
    %c0_18 = arith.constant 0 : index
    %21 = vector.load %arg12[%c0_16, %c0_17, %c0_18] : memref<9x32x32xbf16, #tpu.memory_space<vmem>>, vector<1x32x32xbf16>
    %22 = vector.shape_cast %21 : vector<1x32x32xbf16> to vector<32x32xbf16>
    %cst_19 = arith.constant dense<0.000000e+00> : vector<32x32xf32>
    %23 = tpu.matmul %20, %22, %cst_19 {dimension_numbers = #tpu.dot_dimension_numbers<[1], [0], [0], [1], [0, 0, 1, 1], [], []>} : vector<32x32xbf16>, vector<32x32xbf16>, vector<32x32xf32> -> vector<32x32xf32>
    %24 = arith.truncf %23 : vector<32x32xf32> to vector<32x32xbf16>
    %c1 = arith.constant 1 : index
    %c0_20 = arith.constant 0 : index
    %c0_21 = arith.constant 0 : index
    %25 = vector.load %arg12[%c1, %c0_20, %c0_21] : memref<9x32x32xbf16, #tpu.memory_space<vmem>>, vector<1x32x32xbf16>
    %26 = vector.shape_cast %25 : vector<1x32x32xbf16> to vector<32x32xbf16>
    %cst_22 = arith.constant dense<0.000000e+00> : vector<32x32xf32>
    %27 = tpu.matmul %20, %26, %cst_22 {dimension_numbers = #tpu.dot_dimension_numbers<[1], [0], [0], [1], [0, 0, 1, 1], [], []>} : vector<32x32xbf16>, vector<32x32xbf16>, vector<32x32xf32> -> vector<32x32xf32>
    %28 = arith.truncf %27 : vector<32x32xf32> to vector<32x32xbf16>
    %c2 = arith.constant 2 : index
    %c0_23 = arith.constant 0 : index
    %c0_24 = arith.constant 0 : index
    %29 = vector.load %arg12[%c2, %c0_23, %c0_24] : memref<9x32x32xbf16, #tpu.memory_space<vmem>>, vector<1x32x32xbf16>
    %30 = vector.shape_cast %29 : vector<1x32x32xbf16> to vector<32x32xbf16>
    %cst_25 = arith.constant dense<0.000000e+00> : vector<32x32xf32>
    %31 = tpu.matmul %20, %30, %cst_25 {dimension_numbers = #tpu.dot_dimension_numbers<[1], [0], [0], [1], [0, 0, 1, 1], [], []>} : vector<32x32xbf16>, vector<32x32xbf16>, vector<32x32xf32> -> vector<32x32xf32>
    %32 = arith.truncf %31 : vector<32x32xf32> to vector<32x32xbf16>
    %c3 = arith.constant 3 : index
    %c0_26 = arith.constant 0 : index
    %c0_27 = arith.constant 0 : index
    %33 = vector.load %arg12[%c3, %c0_26, %c0_27] : memref<9x32x32xbf16, #tpu.memory_space<vmem>>, vector<1x32x32xbf16>
    %34 = vector.shape_cast %33 : vector<1x32x32xbf16> to vector<32x32xbf16>
    %cst_28 = arith.constant dense<0.000000e+00> : vector<32x32xf32>
    %35 = tpu.matmul %20, %34, %cst_28 {dimension_numbers = #tpu.dot_dimension_numbers<[1], [0], [0], [1], [0, 0, 1, 1], [], []>} : vector<32x32xbf16>, vector<32x32xbf16>, vector<32x32xf32> -> vector<32x32xf32>
    %36 = arith.truncf %35 : vector<32x32xf32> to vector<32x32xbf16>
    %c5 = arith.constant 5 : index
    %c0_29 = arith.constant 0 : index
    %c0_30 = arith.constant 0 : index
    %37 = vector.load %arg12[%c5, %c0_29, %c0_30] : memref<9x32x32xbf16, #tpu.memory_space<vmem>>, vector<1x32x32xbf16>
    %38 = vector.shape_cast %37 : vector<1x32x32xbf16> to vector<32x32xbf16>
    %cst_31 = arith.constant dense<0.000000e+00> : vector<32x32xf32>
    %39 = tpu.matmul %20, %38, %cst_31 {dimension_numbers = #tpu.dot_dimension_numbers<[1], [0], [0], [1], [0, 0, 1, 1], [], []>} : vector<32x32xbf16>, vector<32x32xbf16>, vector<32x32xf32> -> vector<32x32xf32>
    %40 = arith.truncf %39 : vector<32x32xf32> to vector<32x32xbf16>
    %c6 = arith.constant 6 : index
    %c0_32 = arith.constant 0 : index
    %c0_33 = arith.constant 0 : index
    %41 = vector.load %arg12[%c6, %c0_32, %c0_33] : memref<9x32x32xbf16, #tpu.memory_space<vmem>>, vector<1x32x32xbf16>
    %42 = vector.shape_cast %41 : vector<1x32x32xbf16> to vector<32x32xbf16>
    %cst_34 = arith.constant dense<0.000000e+00> : vector<32x32xf32>
    %43 = tpu.matmul %20, %42, %cst_34 {dimension_numbers = #tpu.dot_dimension_numbers<[1], [0], [0], [1], [0, 0, 1, 1], [], []>} : vector<32x32xbf16>, vector<32x32xbf16>, vector<32x32xf32> -> vector<32x32xf32>
    %44 = arith.truncf %43 : vector<32x32xf32> to vector<32x32xbf16>
    %c7 = arith.constant 7 : index
    %c0_35 = arith.constant 0 : index
    %c0_36 = arith.constant 0 : index
    %45 = vector.load %arg12[%c7, %c0_35, %c0_36] : memref<9x32x32xbf16, #tpu.memory_space<vmem>>, vector<1x32x32xbf16>
    %46 = vector.shape_cast %45 : vector<1x32x32xbf16> to vector<32x32xbf16>
    %cst_37 = arith.constant dense<0.000000e+00> : vector<32x32xf32>
    %47 = tpu.matmul %20, %46, %cst_37 {dimension_numbers = #tpu.dot_dimension_numbers<[1], [0], [0], [1], [0, 0, 1, 1], [], []>} : vector<32x32xbf16>, vector<32x32xbf16>, vector<32x32xf32> -> vector<32x32xf32>
    %48 = arith.truncf %47 : vector<32x32xf32> to vector<32x32xbf16>
    %c8 = arith.constant 8 : index
    %c0_38 = arith.constant 0 : index
    %c0_39 = arith.constant 0 : index
    %49 = vector.load %arg12[%c8, %c0_38, %c0_39] : memref<9x32x32xbf16, #tpu.memory_space<vmem>>, vector<1x32x32xbf16>
    %50 = vector.shape_cast %49 : vector<1x32x32xbf16> to vector<32x32xbf16>
    %cst_40 = arith.constant dense<0.000000e+00> : vector<32x32xf32>
    %51 = tpu.matmul %20, %50, %cst_40 {dimension_numbers = #tpu.dot_dimension_numbers<[1], [0], [0], [1], [0, 0, 1, 1], [], []>} : vector<32x32xbf16>, vector<32x32xbf16>, vector<32x32xf32> -> vector<32x32xf32>
    %52 = arith.truncf %51 : vector<32x32xf32> to vector<32x32xbf16>
    %53 = tpu.concatenate %20, %36, %28, %24 in 0 : vector<32x32xbf16>, vector<32x32xbf16>, vector<32x32xbf16>, vector<32x32xbf16> -> vector<128x32xbf16>
    %c0_41 = arith.constant 0 : index
    %c0_42 = arith.constant 0 : index
    %c0_43 = arith.constant 0 : index
    %c0_44 = arith.constant 0 : index
    %54 = vector.load %arg6[%c0_41, %c0_42, %c0_43, %c0_44] : memref<1x4x16x128xbf16, #tpu.memory_space<vmem>>, vector<1x1x16x128xbf16>
    %55 = vector.shape_cast %54 : vector<1x1x16x128xbf16> to vector<16x128xbf16>
    %cst_45 = arith.constant dense<0.000000e+00> : vector<16x32xf32>
    %56 = tpu.matmul %55, %53, %cst_45 {dimension_numbers = #tpu.dot_dimension_numbers<[1], [0], [0], [1], [0, 0, 1, 1], [], []>} : vector<16x128xbf16>, vector<128x32xbf16>, vector<16x32xf32> -> vector<16x32xf32>
    %c0_46 = arith.constant 0 : index
    %c0_47 = arith.constant 0 : index
    %c0_48 = arith.constant 0 : index
    %57 = vector.load %arg7[%c0_46, %c0_47, %c0_48] : memref<1x16x1xf32, #tpu.memory_space<vmem>>, vector<1x16x1xf32>
    %58 = vector.shape_cast %57 : vector<1x16x1xf32> to vector<16x1xf32>
    %59 = vector.broadcast %58 : vector<16x1xf32> to vector<16x32xf32>
    %60 = arith.addf %56, %59 : vector<16x32xf32>
    %cst_49 = arith.constant 0.000000e+00 : f32
    %61 = vector.broadcast %cst_49 : f32 to vector<16x32xf32>
    %62 = arith.maximumf %60, %61 : vector<16x32xf32>
    %63 = arith.truncf %62 : vector<16x32xf32> to vector<16x32xbf16>
    %64 = tpu.concatenate %20, %40, %28, %32 in 0 : vector<32x32xbf16>, vector<32x32xbf16>, vector<32x32xbf16>, vector<32x32xbf16> -> vector<128x32xbf16>
    %c0_50 = arith.constant 0 : index
    %c1_51 = arith.constant 1 : index
    %c0_52 = arith.constant 0 : index
    %c0_53 = arith.constant 0 : index
    %65 = vector.load %arg6[%c0_50, %c1_51, %c0_52, %c0_53] : memref<1x4x16x128xbf16, #tpu.memory_space<vmem>>, vector<1x1x16x128xbf16>
    %66 = vector.shape_cast %65 : vector<1x1x16x128xbf16> to vector<16x128xbf16>
    %cst_54 = arith.constant dense<0.000000e+00> : vector<16x32xf32>
    %67 = tpu.matmul %66, %64, %cst_54 {dimension_numbers = #tpu.dot_dimension_numbers<[1], [0], [0], [1], [0, 0, 1, 1], [], []>} : vector<16x128xbf16>, vector<128x32xbf16>, vector<16x32xf32> -> vector<16x32xf32>
    %c0_55 = arith.constant 0 : index
    %c0_56 = arith.constant 0 : index
    %c0_57 = arith.constant 0 : index
    %68 = vector.load %arg7[%c0_55, %c0_56, %c0_57] : memref<1x16x1xf32, #tpu.memory_space<vmem>>, vector<1x16x1xf32>
    %69 = vector.shape_cast %68 : vector<1x16x1xf32> to vector<16x1xf32>
    %70 = vector.broadcast %69 : vector<16x1xf32> to vector<16x32xf32>
    %71 = arith.addf %67, %70 : vector<16x32xf32>
    %cst_58 = arith.constant 0.000000e+00 : f32
    %72 = vector.broadcast %cst_58 : f32 to vector<16x32xf32>
    %73 = arith.maximumf %71, %72 : vector<16x32xf32>
    %74 = arith.truncf %73 : vector<16x32xf32> to vector<16x32xbf16>
    %75 = tpu.concatenate %20, %36, %48, %44 in 0 : vector<32x32xbf16>, vector<32x32xbf16>, vector<32x32xbf16>, vector<32x32xbf16> -> vector<128x32xbf16>
    %c0_59 = arith.constant 0 : index
    %c2_60 = arith.constant 2 : index
    %c0_61 = arith.constant 0 : index
    %c0_62 = arith.constant 0 : index
    %76 = vector.load %arg6[%c0_59, %c2_60, %c0_61, %c0_62] : memref<1x4x16x128xbf16, #tpu.memory_space<vmem>>, vector<1x1x16x128xbf16>
    %77 = vector.shape_cast %76 : vector<1x1x16x128xbf16> to vector<16x128xbf16>
    %cst_63 = arith.constant dense<0.000000e+00> : vector<16x32xf32>
    %78 = tpu.matmul %77, %75, %cst_63 {dimension_numbers = #tpu.dot_dimension_numbers<[1], [0], [0], [1], [0, 0, 1, 1], [], []>} : vector<16x128xbf16>, vector<128x32xbf16>, vector<16x32xf32> -> vector<16x32xf32>
    %c0_64 = arith.constant 0 : index
    %c0_65 = arith.constant 0 : index
    %c0_66 = arith.constant 0 : index
    %79 = vector.load %arg7[%c0_64, %c0_65, %c0_66] : memref<1x16x1xf32, #tpu.memory_space<vmem>>, vector<1x16x1xf32>
    %80 = vector.shape_cast %79 : vector<1x16x1xf32> to vector<16x1xf32>
    %81 = vector.broadcast %80 : vector<16x1xf32> to vector<16x32xf32>
    %82 = arith.addf %78, %81 : vector<16x32xf32>
    %cst_67 = arith.constant 0.000000e+00 : f32
    %83 = vector.broadcast %cst_67 : f32 to vector<16x32xf32>
    %84 = arith.maximumf %82, %83 : vector<16x32xf32>
    %85 = arith.truncf %84 : vector<16x32xf32> to vector<16x32xbf16>
    %86 = tpu.concatenate %20, %40, %48, %52 in 0 : vector<32x32xbf16>, vector<32x32xbf16>, vector<32x32xbf16>, vector<32x32xbf16> -> vector<128x32xbf16>
    %c0_68 = arith.constant 0 : index
    %c3_69 = arith.constant 3 : index
    %c0_70 = arith.constant 0 : index
    %c0_71 = arith.constant 0 : index
    %87 = vector.load %arg6[%c0_68, %c3_69, %c0_70, %c0_71] : memref<1x4x16x128xbf16, #tpu.memory_space<vmem>>, vector<1x1x16x128xbf16>
    %88 = vector.shape_cast %87 : vector<1x1x16x128xbf16> to vector<16x128xbf16>
    %cst_72 = arith.constant dense<0.000000e+00> : vector<16x32xf32>
    %89 = tpu.matmul %88, %86, %cst_72 {dimension_numbers = #tpu.dot_dimension_numbers<[1], [0], [0], [1], [0, 0, 1, 1], [], []>} : vector<16x128xbf16>, vector<128x32xbf16>, vector<16x32xf32> -> vector<16x32xf32>
    %c0_73 = arith.constant 0 : index
    %c0_74 = arith.constant 0 : index
    %c0_75 = arith.constant 0 : index
    %90 = vector.load %arg7[%c0_73, %c0_74, %c0_75] : memref<1x16x1xf32, #tpu.memory_space<vmem>>, vector<1x16x1xf32>
    %91 = vector.shape_cast %90 : vector<1x16x1xf32> to vector<16x1xf32>
    %92 = vector.broadcast %91 : vector<16x1xf32> to vector<16x32xf32>
    %93 = arith.addf %89, %92 : vector<16x32xf32>
    %cst_76 = arith.constant 0.000000e+00 : f32
    %94 = vector.broadcast %cst_76 : f32 to vector<16x32xf32>
    %95 = arith.maximumf %93, %94 : vector<16x32xf32>
    %96 = arith.truncf %95 : vector<16x32xf32> to vector<16x32xbf16>
    %97 = tpu.concatenate %63, %74, %85, %96 in 1 : vector<16x32xbf16>, vector<16x32xbf16>, vector<16x32xbf16>, vector<16x32xbf16> -> vector<16x128xbf16>
    %c0_77 = arith.constant 0 : index
    %c0_78 = arith.constant 0 : index
    %c0_79 = arith.constant 0 : index
    %98 = vector.load %arg8[%c0_77, %c0_78, %c0_79] : memref<1x16x16xbf16, #tpu.memory_space<vmem>>, vector<1x16x16xbf16>
    %99 = vector.shape_cast %98 : vector<1x16x16xbf16> to vector<16x16xbf16>
    %cst_80 = arith.constant dense<0.000000e+00> : vector<16x128xf32>
    %100 = tpu.matmul %99, %97, %cst_80 {dimension_numbers = #tpu.dot_dimension_numbers<[1], [0], [0], [1], [0, 0, 1, 1], [], []>} : vector<16x16xbf16>, vector<16x128xbf16>, vector<16x128xf32> -> vector<16x128xf32>
    %c0_81 = arith.constant 0 : index
    %c0_82 = arith.constant 0 : index
    %c0_83 = arith.constant 0 : index
    %101 = vector.load %arg9[%c0_81, %c0_82, %c0_83] : memref<1x16x1xf32, #tpu.memory_space<vmem>>, vector<1x16x1xf32>
    %102 = vector.shape_cast %101 : vector<1x16x1xf32> to vector<16x1xf32>
    %103 = vector.broadcast %102 : vector<16x1xf32> to vector<16x128xf32>
    %104 = arith.addf %100, %103 : vector<16x128xf32>
    %cst_84 = arith.constant 0.000000e+00 : f32
    %105 = vector.broadcast %cst_84 : f32 to vector<16x128xf32>
    %106 = arith.maximumf %104, %105 : vector<16x128xf32>
    %107 = arith.truncf %106 : vector<16x128xf32> to vector<16x128xbf16>
    %c0_85 = arith.constant 0 : index
    %c0_86 = arith.constant 0 : index
    %c0_87 = arith.constant 0 : index
    %108 = vector.load %arg13[%c0_85, %c0_86, %c0_87] : memref<9x128x128xbf16, #tpu.memory_space<vmem>>, vector<1x128x128xbf16>
    %109 = vector.shape_cast %108 : vector<1x128x128xbf16> to vector<128x128xbf16>
    %cst_88 = arith.constant dense<0.000000e+00> : vector<16x128xf32>
    %110 = tpu.matmul %107, %109, %cst_88 {dimension_numbers = #tpu.dot_dimension_numbers<[1], [0], [0], [1], [0, 0, 1, 1], [], []>} : vector<16x128xbf16>, vector<128x128xbf16>, vector<16x128xf32> -> vector<16x128xf32>
    %111 = arith.truncf %110 : vector<16x128xf32> to vector<16x128xbf16>
    %c1_89 = arith.constant 1 : index
    %c0_90 = arith.constant 0 : index
    %c0_91 = arith.constant 0 : index
    %112 = vector.load %arg13[%c1_89, %c0_90, %c0_91] : memref<9x128x128xbf16, #tpu.memory_space<vmem>>, vector<1x128x128xbf16>
    %113 = vector.shape_cast %112 : vector<1x128x128xbf16> to vector<128x128xbf16>
    %cst_92 = arith.constant dense<0.000000e+00> : vector<16x128xf32>
    %114 = tpu.matmul %107, %113, %cst_92 {dimension_numbers = #tpu.dot_dimension_numbers<[1], [0], [0], [1], [0, 0, 1, 1], [], []>} : vector<16x128xbf16>, vector<128x128xbf16>, vector<16x128xf32> -> vector<16x128xf32>
    %115 = arith.truncf %114 : vector<16x128xf32> to vector<16x128xbf16>
    %c2_93 = arith.constant 2 : index
    %c0_94 = arith.constant 0 : index
    %c0_95 = arith.constant 0 : index
    %116 = vector.load %arg13[%c2_93, %c0_94, %c0_95] : memref<9x128x128xbf16, #tpu.memory_space<vmem>>, vector<1x128x128xbf16>
    %117 = vector.shape_cast %116 : vector<1x128x128xbf16> to vector<128x128xbf16>
    %cst_96 = arith.constant dense<0.000000e+00> : vector<16x128xf32>
    %118 = tpu.matmul %107, %117, %cst_96 {dimension_numbers = #tpu.dot_dimension_numbers<[1], [0], [0], [1], [0, 0, 1, 1], [], []>} : vector<16x128xbf16>, vector<128x128xbf16>, vector<16x128xf32> -> vector<16x128xf32>
    %119 = arith.truncf %118 : vector<16x128xf32> to vector<16x128xbf16>
    %c3_97 = arith.constant 3 : index
    %c0_98 = arith.constant 0 : index
    %c0_99 = arith.constant 0 : index
    %120 = vector.load %arg13[%c3_97, %c0_98, %c0_99] : memref<9x128x128xbf16, #tpu.memory_space<vmem>>, vector<1x128x128xbf16>
    %121 = vector.shape_cast %120 : vector<1x128x128xbf16> to vector<128x128xbf16>
    %cst_100 = arith.constant dense<0.000000e+00> : vector<16x128xf32>
    %122 = tpu.matmul %107, %121, %cst_100 {dimension_numbers = #tpu.dot_dimension_numbers<[1], [0], [0], [1], [0, 0, 1, 1], [], []>} : vector<16x128xbf16>, vector<128x128xbf16>, vector<16x128xf32> -> vector<16x128xf32>
    %123 = arith.truncf %122 : vector<16x128xf32> to vector<16x128xbf16>
    %c5_101 = arith.constant 5 : index
    %c0_102 = arith.constant 0 : index
    %c0_103 = arith.constant 0 : index
    %124 = vector.load %arg13[%c5_101, %c0_102, %c0_103] : memref<9x128x128xbf16, #tpu.memory_space<vmem>>, vector<1x128x128xbf16>
    %125 = vector.shape_cast %124 : vector<1x128x128xbf16> to vector<128x128xbf16>
    %cst_104 = arith.constant dense<0.000000e+00> : vector<16x128xf32>
    %126 = tpu.matmul %107, %125, %cst_104 {dimension_numbers = #tpu.dot_dimension_numbers<[1], [0], [0], [1], [0, 0, 1, 1], [], []>} : vector<16x128xbf16>, vector<128x128xbf16>, vector<16x128xf32> -> vector<16x128xf32>
    %127 = arith.truncf %126 : vector<16x128xf32> to vector<16x128xbf16>
    %c6_105 = arith.constant 6 : index
    %c0_106 = arith.constant 0 : index
    %c0_107 = arith.constant 0 : index
    %128 = vector.load %arg13[%c6_105, %c0_106, %c0_107] : memref<9x128x128xbf16, #tpu.memory_space<vmem>>, vector<1x128x128xbf16>
    %129 = vector.shape_cast %128 : vector<1x128x128xbf16> to vector<128x128xbf16>
    %cst_108 = arith.constant dense<0.000000e+00> : vector<16x128xf32>
    %130 = tpu.matmul %107, %129, %cst_108 {dimension_numbers = #tpu.dot_dimension_numbers<[1], [0], [0], [1], [0, 0, 1, 1], [], []>} : vector<16x128xbf16>, vector<128x128xbf16>, vector<16x128xf32> -> vector<16x128xf32>
    %131 = arith.truncf %130 : vector<16x128xf32> to vector<16x128xbf16>
    %c7_109 = arith.constant 7 : index
    %c0_110 = arith.constant 0 : index
    %c0_111 = arith.constant 0 : index
    %132 = vector.load %arg13[%c7_109, %c0_110, %c0_111] : memref<9x128x128xbf16, #tpu.memory_space<vmem>>, vector<1x128x128xbf16>
    %133 = vector.shape_cast %132 : vector<1x128x128xbf16> to vector<128x128xbf16>
    %cst_112 = arith.constant dense<0.000000e+00> : vector<16x128xf32>
    %134 = tpu.matmul %107, %133, %cst_112 {dimension_numbers = #tpu.dot_dimension_numbers<[1], [0], [0], [1], [0, 0, 1, 1], [], []>} : vector<16x128xbf16>, vector<128x128xbf16>, vector<16x128xf32> -> vector<16x128xf32>
    %135 = arith.truncf %134 : vector<16x128xf32> to vector<16x128xbf16>
    %c8_113 = arith.constant 8 : index
    %c0_114 = arith.constant 0 : index
    %c0_115 = arith.constant 0 : index
    %136 = vector.load %arg13[%c8_113, %c0_114, %c0_115] : memref<9x128x128xbf16, #tpu.memory_space<vmem>>, vector<1x128x128xbf16>
    %137 = vector.shape_cast %136 : vector<1x128x128xbf16> to vector<128x128xbf16>
    %cst_116 = arith.constant dense<0.000000e+00> : vector<16x128xf32>
    %138 = tpu.matmul %107, %137, %cst_116 {dimension_numbers = #tpu.dot_dimension_numbers<[1], [0], [0], [1], [0, 0, 1, 1], [], []>} : vector<16x128xbf16>, vector<128x128xbf16>, vector<16x128xf32> -> vector<16x128xf32>
    %139 = arith.truncf %138 : vector<16x128xf32> to vector<16x128xbf16>
    %140 = tpu.concatenate %107, %123, %115, %111 in 0 : vector<16x128xbf16>, vector<16x128xbf16>, vector<16x128xbf16>, vector<16x128xbf16> -> vector<64x128xbf16>
    %c0_117 = arith.constant 0 : index
    %c0_118 = arith.constant 0 : index
    %c0_119 = arith.constant 0 : index
    %c0_120 = arith.constant 0 : index
    %141 = vector.load %arg10[%c0_117, %c0_118, %c0_119, %c0_120] : memref<1x4x8x64xbf16, #tpu.memory_space<vmem>>, vector<1x1x8x64xbf16>
    %142 = vector.shape_cast %141 : vector<1x1x8x64xbf16> to vector<8x64xbf16>
    %cst_121 = arith.constant dense<0.000000e+00> : vector<8x128xf32>
    %143 = tpu.matmul %142, %140, %cst_121 {dimension_numbers = #tpu.dot_dimension_numbers<[1], [0], [0], [1], [0, 0, 1, 1], [], []>} : vector<8x64xbf16>, vector<64x128xbf16>, vector<8x128xf32> -> vector<8x128xf32>
    %c0_122 = arith.constant 0 : index
    %c0_123 = arith.constant 0 : index
    %c0_124 = arith.constant 0 : index
    %144 = vector.load %arg11[%c0_122, %c0_123, %c0_124] : memref<1x8x1xf32, #tpu.memory_space<vmem>>, vector<1x8x1xf32>
    %145 = vector.shape_cast %144 : vector<1x8x1xf32> to vector<8x1xf32>
    %146 = vector.broadcast %145 : vector<8x1xf32> to vector<8x128xf32>
    %147 = arith.addf %143, %146 : vector<8x128xf32>
    %cst_125 = arith.constant 0.000000e+00 : f32
    %148 = vector.broadcast %cst_125 : f32 to vector<8x128xf32>
    %149 = arith.maximumf %147, %148 : vector<8x128xf32>
    %150 = arith.truncf %149 : vector<8x128xf32> to vector<8x128xbf16>
    %151 = tpu.concatenate %107, %127, %115, %119 in 0 : vector<16x128xbf16>, vector<16x128xbf16>, vector<16x128xbf16>, vector<16x128xbf16> -> vector<64x128xbf16>
    %c0_126 = arith.constant 0 : index
    %c1_127 = arith.constant 1 : index
    %c0_128 = arith.constant 0 : index
    %c0_129 = arith.constant 0 : index
    %152 = vector.load %arg10[%c0_126, %c1_127, %c0_128, %c0_129] : memref<1x4x8x64xbf16, #tpu.memory_space<vmem>>, vector<1x1x8x64xbf16>
    %153 = vector.shape_cast %152 : vector<1x1x8x64xbf16> to vector<8x64xbf16>
    %cst_130 = arith.constant dense<0.000000e+00> : vector<8x128xf32>
    %154 = tpu.matmul %153, %151, %cst_130 {dimension_numbers = #tpu.dot_dimension_numbers<[1], [0], [0], [1], [0, 0, 1, 1], [], []>} : vector<8x64xbf16>, vector<64x128xbf16>, vector<8x128xf32> -> vector<8x128xf32>
    %c0_131 = arith.constant 0 : index
    %c0_132 = arith.constant 0 : index
    %c0_133 = arith.constant 0 : index
    %155 = vector.load %arg11[%c0_131, %c0_132, %c0_133] : memref<1x8x1xf32, #tpu.memory_space<vmem>>, vector<1x8x1xf32>
    %156 = vector.shape_cast %155 : vector<1x8x1xf32> to vector<8x1xf32>
    %157 = vector.broadcast %156 : vector<8x1xf32> to vector<8x128xf32>
    %158 = arith.addf %154, %157 : vector<8x128xf32>
    %cst_134 = arith.constant 0.000000e+00 : f32
    %159 = vector.broadcast %cst_134 : f32 to vector<8x128xf32>
    %160 = arith.maximumf %158, %159 : vector<8x128xf32>
    %161 = arith.truncf %160 : vector<8x128xf32> to vector<8x128xbf16>
    %162 = tpu.concatenate %107, %123, %135, %131 in 0 : vector<16x128xbf16>, vector<16x128xbf16>, vector<16x128xbf16>, vector<16x128xbf16> -> vector<64x128xbf16>
    %c0_135 = arith.constant 0 : index
    %c2_136 = arith.constant 2 : index
    %c0_137 = arith.constant 0 : index
    %c0_138 = arith.constant 0 : index
    %163 = vector.load %arg10[%c0_135, %c2_136, %c0_137, %c0_138] : memref<1x4x8x64xbf16, #tpu.memory_space<vmem>>, vector<1x1x8x64xbf16>
    %164 = vector.shape_cast %163 : vector<1x1x8x64xbf16> to vector<8x64xbf16>
    %cst_139 = arith.constant dense<0.000000e+00> : vector<8x128xf32>
    %165 = tpu.matmul %164, %162, %cst_139 {dimension_numbers = #tpu.dot_dimension_numbers<[1], [0], [0], [1], [0, 0, 1, 1], [], []>} : vector<8x64xbf16>, vector<64x128xbf16>, vector<8x128xf32> -> vector<8x128xf32>
    %c0_140 = arith.constant 0 : index
    %c0_141 = arith.constant 0 : index
    %c0_142 = arith.constant 0 : index
    %166 = vector.load %arg11[%c0_140, %c0_141, %c0_142] : memref<1x8x1xf32, #tpu.memory_space<vmem>>, vector<1x8x1xf32>
    %167 = vector.shape_cast %166 : vector<1x8x1xf32> to vector<8x1xf32>
    %168 = vector.broadcast %167 : vector<8x1xf32> to vector<8x128xf32>
    %169 = arith.addf %165, %168 : vector<8x128xf32>
    %cst_143 = arith.constant 0.000000e+00 : f32
    %170 = vector.broadcast %cst_143 : f32 to vector<8x128xf32>
    %171 = arith.maximumf %169, %170 : vector<8x128xf32>
    %172 = arith.truncf %171 : vector<8x128xf32> to vector<8x128xbf16>
    %173 = tpu.concatenate %107, %127, %135, %139 in 0 : vector<16x128xbf16>, vector<16x128xbf16>, vector<16x128xbf16>, vector<16x128xbf16> -> vector<64x128xbf16>
    %c0_144 = arith.constant 0 : index
    %c3_145 = arith.constant 3 : index
    %c0_146 = arith.constant 0 : index
    %c0_147 = arith.constant 0 : index
    %174 = vector.load %arg10[%c0_144, %c3_145, %c0_146, %c0_147] : memref<1x4x8x64xbf16, #tpu.memory_space<vmem>>, vector<1x1x8x64xbf16>
    %175 = vector.shape_cast %174 : vector<1x1x8x64xbf16> to vector<8x64xbf16>
    %cst_148 = arith.constant dense<0.000000e+00> : vector<8x128xf32>
    %176 = tpu.matmul %175, %173, %cst_148 {dimension_numbers = #tpu.dot_dimension_numbers<[1], [0], [0], [1], [0, 0, 1, 1], [], []>} : vector<8x64xbf16>, vector<64x128xbf16>, vector<8x128xf32> -> vector<8x128xf32>
    %c0_149 = arith.constant 0 : index
    %c0_150 = arith.constant 0 : index
    %c0_151 = arith.constant 0 : index
    %177 = vector.load %arg11[%c0_149, %c0_150, %c0_151] : memref<1x8x1xf32, #tpu.memory_space<vmem>>, vector<1x8x1xf32>
    %178 = vector.shape_cast %177 : vector<1x8x1xf32> to vector<8x1xf32>
    %179 = vector.broadcast %178 : vector<8x1xf32> to vector<8x128xf32>
    %180 = arith.addf %176, %179 : vector<8x128xf32>
    %cst_152 = arith.constant 0.000000e+00 : f32
    %181 = vector.broadcast %cst_152 : f32 to vector<8x128xf32>
    %182 = arith.maximumf %180, %181 : vector<8x128xf32>
    %183 = arith.truncf %182 : vector<8x128xf32> to vector<8x128xbf16>
    %184 = tpu.concatenate %150, %161, %172, %183 in 1 : vector<8x128xbf16>, vector<8x128xbf16>, vector<8x128xbf16>, vector<8x128xbf16> -> vector<8x512xbf16>
    %c0_153 = arith.constant 0 : index
    %c0_154 = arith.constant 0 : index
    %185 = vector.load %arg14[%c0_153, %c0_154] : memref<512x512xbf16, #tpu.memory_space<vmem>>, vector<512x512xbf16>
    %cst_155 = arith.constant dense<0.000000e+00> : vector<8x512xf32>
    %186 = tpu.matmul %184, %185, %cst_155 {dimension_numbers = #tpu.dot_dimension_numbers<[1], [0], [0], [1], [0, 0, 1, 1], [], []>} : vector<8x512xbf16>, vector<512x512xbf16>, vector<8x512xf32> -> vector<8x512xf32>
    %187 = vector.extract_strided_slice %186 {offsets = [0, 0], sizes = [8, 256], strides = [1, 1]} : vector<8x512xf32> to vector<8x256xf32>
    %188 = vector.shape_cast %187 : vector<8x256xf32> to vector<1x1x8x256xf32>
    %189 = vector.extract_strided_slice %186 {offsets = [0, 256], sizes = [8, 256], strides = [1, 1]} : vector<8x512xf32> to vector<8x256xf32>
    %190 = vector.shape_cast %189 : vector<8x256xf32> to vector<1x1x8x256xf32>
    %191 = tpu.concatenate %188, %190 in 0 : vector<1x1x8x256xf32>, vector<1x1x8x256xf32> -> vector<2x1x8x256xf32>
    %c0_156 = arith.constant 0 : index
    %c0_157 = arith.constant 0 : index
    %c0_158 = arith.constant 0 : index
    %c0_159 = arith.constant 0 : index
    %192 = vector.load %arg15[%c0_156, %c0_157, %c0_158, %c0_159] : memref<2x1x8x256xf32, #tpu.memory_space<vmem>>, vector<2x1x8x256xf32>
    tpu.vector_store %arg15[%c0_156, %c0_157, %c0_158, %c0_159], %191 {strides = array<i32>} : memref<2x1x8x256xf32, #tpu.memory_space<vmem>>, vector<2x1x8x256xf32>,
    return
  }
  func.func @transform_0(%arg0: i32) -> (i32, i32) {
    %c0_i32 = arith.constant 0 : i32
    %c0_i32_0 = arith.constant 0 : i32
    %c0_i32_1 = arith.constant 0 : i32
    return %c0_i32, %c0_i32_0 : i32, i32
  }
  func.func @transform_1(%arg0: i32) -> (i32, i32, i32) {
    %c0_i32 = arith.constant 0 : i32
    %c0_i32_0 = arith.constant 0 : i32
    %c0_i32_1 = arith.constant 0 : i32
    return %arg0, %c0_i32, %c0_i32_0 : i32, i32, i32
  }
  func.func @transform_2(%arg0: i32) -> (i32, i32, i32) {
    %c0_i32 = arith.constant 0 : i32
    %c0_i32_0 = arith.constant 0 : i32
    %c0_i32_1 = arith.constant 0 : i32
    return %arg0, %c0_i32, %c0_i32_0 : i32, i32, i32
  }
  func.func @transform_3(%arg0: i32) -> (i32, i32, i32) {
    %c0_i32 = arith.constant 0 : i32
    %c0_i32_0 = arith.constant 0 : i32
    %c0_i32_1 = arith.constant 0 : i32
    return %arg0, %c0_i32, %c0_i32_0 : i32, i32, i32
  }
  func.func @transform_4(%arg0: i32) -> (i32, i32, i32) {
    %c0_i32 = arith.constant 0 : i32
    %c0_i32_0 = arith.constant 0 : i32
    %c0_i32_1 = arith.constant 0 : i32
    return %arg0, %c0_i32, %c0_i32_0 : i32, i32, i32
  }
  func.func @transform_5(%arg0: i32) -> (i32, i32, i32, i32) {
    %c0_i32 = arith.constant 0 : i32
    %c0_i32_0 = arith.constant 0 : i32
    %c0_i32_1 = arith.constant 0 : i32
    %c0_i32_2 = arith.constant 0 : i32
    return %arg0, %c0_i32, %c0_i32_0, %c0_i32_1 : i32, i32, i32, i32
  }
  func.func @transform_6(%arg0: i32) -> (i32, i32, i32) {
    %c0_i32 = arith.constant 0 : i32
    %c0_i32_0 = arith.constant 0 : i32
    %c0_i32_1 = arith.constant 0 : i32
    return %arg0, %c0_i32, %c0_i32_0 : i32, i32, i32
  }
  func.func @transform_7(%arg0: i32) -> (i32, i32, i32) {
    %c0_i32 = arith.constant 0 : i32
    %c0_i32_0 = arith.constant 0 : i32
    %c0_i32_1 = arith.constant 0 : i32
    return %arg0, %c0_i32, %c0_i32_0 : i32, i32, i32
  }
  func.func @transform_8(%arg0: i32) -> (i32, i32, i32) {
    %c0_i32 = arith.constant 0 : i32
    %c0_i32_0 = arith.constant 0 : i32
    %c0_i32_1 = arith.constant 0 : i32
    return %arg0, %c0_i32, %c0_i32_0 : i32, i32, i32
  }
  func.func @transform_9(%arg0: i32) -> (i32, i32, i32, i32) {
    %c0_i32 = arith.constant 0 : i32
    %c0_i32_0 = arith.constant 0 : i32
    %c0_i32_1 = arith.constant 0 : i32
    %c0_i32_2 = arith.constant 0 : i32
    return %arg0, %c0_i32, %c0_i32_0, %c0_i32_1 : i32, i32, i32, i32
  }
  func.func @transform_10(%arg0: i32) -> (i32, i32, i32) {
    %c0_i32 = arith.constant 0 : i32
    %c0_i32_0 = arith.constant 0 : i32
    %c0_i32_1 = arith.constant 0 : i32
    return %arg0, %c0_i32, %c0_i32_0 : i32, i32, i32
  }
  func.func @transform_11(%arg0: i32) -> (i32, i32, i32) {
    %c0_i32 = arith.constant 0 : i32
    %c0_i32_0 = arith.constant 0 : i32
    %c0_i32_1 = arith.constant 0 : i32
    %c0_i32_2 = arith.constant 0 : i32
    return %c0_i32, %c0_i32_0, %c0_i32_1 : i32, i32, i32
  }
  func.func @transform_12(%arg0: i32) -> (i32, i32, i32) {
    %c0_i32 = arith.constant 0 : i32
    %c0_i32_0 = arith.constant 0 : i32
    %c0_i32_1 = arith.constant 0 : i32
    %c0_i32_2 = arith.constant 0 : i32
    return %c0_i32, %c0_i32_0, %c0_i32_1 : i32, i32, i32
  }
  func.func @transform_13(%arg0: i32) -> (i32, i32) {
    %c0_i32 = arith.constant 0 : i32
    %c0_i32_0 = arith.constant 0 : i32
    %c0_i32_1 = arith.constant 0 : i32
    return %c0_i32, %c0_i32_0 : i32, i32
  }
  func.func @transform_14(%arg0: i32) -> (i32, i32, i32, i32) {
    %c0_i32 = arith.constant 0 : i32
    %c0_i32_0 = arith.constant 0 : i32
    %c0_i32_1 = arith.constant 0 : i32
    %c0_i32_2 = arith.constant 0 : i32
    return %c0_i32, %arg0, %c0_i32_0, %c0_i32_1 : i32, i32, i32, i32
  }
}

</mosaic_0001>

<bundles_post_ra>
// kernel: generator_forward.1
= control target key start
LH: loop header
LB: loop body
LE: loop exit
PB: predicated region body
PF: predicated region fallthrough
CT: control target
= control target key end

     0   :  { %s6829_s0 = inlined_call_operand.vmem [shape: bf16[256,32], index: 0, kind: input, shape index: {}]   ;;  %s6830_s1 = inlined_call_operand.hbm [shape: bf16[3,32,256], index: 1, kind: input, shape index: {}]   ;;  %s6831_s2 = inlined_call_operand.vmem [shape: f32[3,32,1], index: 2, kind: input, shape index: {}]   ;;  %s6832_s3 = inlined_call_operand.vmem [shape: bf16[3,32,32], index: 3, kind: input, shape index: {}]   ;;  %s6833_s4 = inlined_call_operand.vmem [shape: f32[3,32,1], index: 4, kind: input, shape index: {}]   ;;  %s6834_s5 = inlined_call_operand.hbm [shape: bf16[3,4,16,128], index: 5, kind: input, shape index: {}]   ;;  %s6835_s6 = inlined_call_operand.vmem [shape: f32[3,16,1], index: 6, kind: input, shape index: {}]   ;;  %s6836_s7 = inlined_call_operand.hbm [shape: bf16[3,16,16], index: 7, kind: input, shape index: {}]   ;;  %s6837_s8 = inlined_call_operand.vmem [shape: f32[3,16,1], index: 8, kind: input, shape index: {}]   ;;  %s6838_s9 = inlined_call_operand.hbm [shape: bf16[3,4,8,64], index: 9, kind: input, shape index: {}]   ;;  %s6839_s10 = inlined_call_operand.vmem [shape: f32[3,8,1], index: 10, kind: input, shape index: {}]   ;;  %s6840_s11 = inlined_call_operand.hbm [shape: bf16[9,32,32], index: 11, kind: input, shape index: {}]   ;;  %s6841_s12 = inlined_call_operand.hbm [shape: bf16[9,128,128], index: 12, kind: input, shape index: {}]   ;;  %s6842_s13 = inlined_call_operand.vmem [shape: bf16[512,512], index: 13, kind: input, shape index: {}]   ;;  %s6843_s14 = inlined_call_operand.vmem [shape: f32[2,3,8,256], index: 14, kind: output, shape index: {}]  }
   0x1   :  { %6865 = sst [smem:[#allocation22_spill]] %s6830_s1 }
   0x2   :  { %6866 = sst [smem:[#allocation23_spill]] %s6832_s3 }
   0x3   :  { %6867 = sst [smem:[#allocation24_spill]] %s6834_s5 }
   0x4   :  { %6868 = sst [smem:[#allocation25_spill]] %s6837_s8 }
   0x5   :  { %6869 = sst [smem:[#allocation26_spill]] %s6839_s10 }
   0x6   :  { %6870 = sst [smem:[#allocation27_spill]] %s6840_s11 }
   0x7   :  { %6871 = sst [smem:[#allocation28_spill]] %s6842_s13 }
   0x8   :  { %6872 = sst [smem:[#allocation29_spill]] %s6843_s14 }
   0x9   :  { %19 = vsyncpa [#allocation3], 0 }
   0xa   :  { %21 = vsyncpa [#allocation3 + $0x1], 0 }
   0xb   :  { %22 = vsyncpa [#allocation5], 0 }
   0xc   :  { %24 = vsyncpa [#allocation5 + $0x1], 0 }
   0xd   :  { %25 = vsyncpa [#allocation8], 0 }
   0xe   :  { %27 = vsyncpa [#allocation8 + $0x1], 0 }
   0xf   :  { %28 = vsyncpa [#allocation11], 0  ;;  %s5764_s29 = smov 0   ;;  %s5766_s30 = smov 0  }
  0x10   :  { %s5768_s15 = smov 0   ;;  %s5770_s16 = smov 0  }
  0x11 LB: > { %6873 = sst [smem:[#allocation18_spill]] %s5667_s15  ;;  %s5783_s17 = sadd.s32 4294967295, %s5671_s16   ;;  %s5671_s16 = sphi %s5770_s16, %s6913_s16   ;;  %s5667_s15 = sphi %s5768_s15, %s6915_s15   ;;  %s5663_s30 = sphi %s5766_s30, %s6917_s30   ;;  %s5659_s29 = sphi %s5764_s29, %s6916_s29  }
  0x12   : > { %s5786_s18 = sadd.s32 1, %s5671_s16   ;;  %s62_s20 = sadd.s32 1, %s5667_s15 }
  0x13   : > { %6874 = sst [smem:[#allocation19_spill]] %s5786_s18  ;;  %s59_s19 = ssub.s32 %s5671_s16, %s5786_s18 }
  0x14   : > { %p60_p0 = scmp.eq.s32.totalorder %s59_s19, 0  ;;  %p69_p1 = scmp.ne.s32.totalorder %s5667_s15, %s5663_s30 }
  0x15   : > { %p70_p2 = scmp.eq.s32.totalorder %s5671_s16, 0  ;;  %p75_p3 = scmp.ne.s32.totalorder %s5663_s30, %s5659_s29 }
  0x16   : > { %s5796_s21 = scalar_select %p60_p0, %s5667_s15, %s62_s20  }
  0x17   : > { %p5798_p4 = por %p70_p2, %p69_p1  ;;  %p6849_p5 = scmp.eq.s32.totalorder %s5783_s17, 0 }
  0x18   : > { %6875 = sst [smem:[#allocation20_spill]] %s5796_s21  ;;  %p396_p6 = scmp.eq.s32.totalorder %s5783_s17, 2 }
  0x19   : > { %s6876_s22 = scalar_select %p5798_p4, 1, 0 }
  0x1a   : > { %p4172_p7 = scmp.ge.s32.totalorder %s5671_s16, 1  ;;  %p5807_p8 = por %p6849_p5, %p75_p3 }
  0x1b   : > { %p409_p9 = scmp.lt.s32.totalorder %s5671_s16, 4  ;;  %p5812_p10 = por %p396_p6, %p69_p1 }
  0x1c   : > { %s6877_s23 = scalar_select %p5807_p8, 1, 0 }
  0x1d   : > { %s6878_s24 = scalar_select %p5812_p10, 1, 0 }
  0x1e   : > { %p5816_p11 = pnand %p4172_p7, %p409_p9  ;;  %s5673_s26 = smov [#allocation9]  }
  0x1f   : > { %6879 = sst [smem:[#allocation21_spill]] %s6878_s24  ;;  %s424_s27 = sshll.u32 %s5673_s26, 4  ;;  %s425_s27 = int_to_ptr.vmem [resolvable:$true] %s424_s27 }
  0x20   : > { %s6880_s25 = scalar_select %p5816_p11, 1, 0 }
  0x21   : > { %p5073_p12 = pneg %p5816_p11  ;;  %s5830_s29 = sand.u32 1, %s5667_s15  }
  0x22   : > { %s6854_s19 = sshll.u32 %s5671_s16, 9  ;;  %s6882_s11 = sld [smem:[#allocation27_spill]] }
  0x23   : > { %p5824_p13 = pnand %p5073_p12, %p6849_p5 }
  0x25   : > { %s6881_s28 = scalar_select %p5824_p13, 1, 0 }
  0x26   : > { %p6856_p2 = pneg %p5824_p13 }
  0x28   : > { %s5445_s26 = scalar_lea.hbm %s6882_s11, 2304 }
  0x29   : > { %p5446_p1 = scmp.ne.s32.totalorder %s6882_s11, %s5445_s26  ;;  %p5452_p7 = scmp.lt.u32.totalorder %s5445_s26, %s6882_s11 }
  0x2b   : > { %p5448_p3 = pnand %p6856_p2, %p5446_p1 }
  0x2d   : > { %p5449_p6 = pneg %p5448_p3 }
  0x2f   : > { %p5454_p9 = pnand %p5452_p7, %p5449_p6 }
  0x31   : > { %5457 = shalt.err (!%p5454_p9)
}
  0x32   : > { %s5458_s20 = scalar_lea.vmem %s425_s27, 2304  ;;  %p5466_p10 = scmp.lt.s32.totalorder %s425_s27, %s425_s27 }
  0x33   : > { %p5459_p12 = scmp.ne.s32.totalorder %s425_s27, %s5458_s20  ;;  %p5467_p8 = scmp.lt.s32.totalorder %s5458_s20, %s5458_s20 }
  0x35   : > { %p5461_p5 = pnand %p5459_p12, %p6856_p2  ;;  %p5468_p11 = por %p5467_p8, %p5466_p10 }
  0x37   : > { %p5462_p0 = pneg %p5461_p5 }
  0x39   : > { %p5469_p4 = pnand %p5468_p11, %p5462_p0 }
  0x3b   : > { %5472 = shalt.err (!%p5469_p4)
}
  0x3c   : > { %s6852_s14 = smov 64   ;;  %s6863_s13 = smov 4  }
  0x3d   : > { %5076 = dma.hbm_to_vmem [thread:$0]  (!%p5824_p13), %s6882_s11, 2304, %s425_s27, [#allocation8], %s6852_s14, %s6852_s14, %s6863_s13  }
  0x3e   : > { %p6883_p5 = scmp.ne.s32.totalorder %s6876_s22, 0  ;;  %p6884_p8 = scmp.lt.s32.totalorder %s5671_s16, 3 }
  0x3f   : > { %s6855_s24 = sand.u32 1, %s5671_s16   ;;  %s6886_s5 = sld [smem:[#allocation24_spill]] }
  0x40   : > { %p5863_p4 = pnand %p6884_p8, %p6883_p5  ;;  %s6887_s8 = sshll.u32 %s5830_s29, 5 }
  0x41   : > { %s503_s27 = scalar_lea.vmem [#allocation4], %s6887_s8  ;;  %s5881_s15 = scalar_lea.sflag [#allocation5], %s6855_s24 }
  0x42   : > { %s6885_s21 = scalar_select %p5863_p4, 1, 0 }
  0x43   : > { %s510_s22 = sshll.u32 %s503_s27, 4  ;;  %p5887_p11 = pneg %p5863_p4  ;;  %s5877_s22 = int_to_ptr.vmem [resolvable:$true] %s510_s22 }
  0x45   : > { %s5873_s10 = scalar_lea.hbm %s6886_s5, %s6854_s19  ;;  %s5478_s8 = scalar_lea.hbm %s6886_s5, 1536 }
  0x46   : > { %s5473_s18 = scalar_lea.hbm %s5873_s10, 512  ;;  %p5479_p3 = scmp.lt.u32.totalorder %s5873_s10, %s6886_s5 }
  0x47   : > { %p5474_p10 = scmp.ne.s32.totalorder %s5873_s10, %s5473_s18  ;;  %p5480_p6 = scmp.lt.u32.totalorder %s5478_s8, %s5473_s18 }
  0x48   : > { %s6888_s14 = scalar_select %p5887_p11, 1, 0 }
  0x49   : > { %p5476_p0 = pnand %p5887_p11, %p5474_p10  ;;  %p5481_p7 = por %p5480_p6, %p5479_p3 }
  0x4a   : > { %p5482_p9 = scmp.lt.u32.totalorder %s5473_s18, %s5873_s10 }
  0x4b   : > { %p5477_p1 = pneg %p5476_p0 }
  0x4c   : > { %p5483_p12 = por %p5482_p9, %p5481_p7 }
  0x4e   : > { %p5484_p5 = pnand %p5483_p12, %p5477_p1 }
  0x50   : > { %5487 = shalt.err (!%p5484_p5)
}
  0x51   : > { %s5488_s24 = scalar_lea.vmem %s5877_s22, 512  ;;  %s5676_s20 = smov [#allocation4]  }
  0x52   : > { %p5489_p8 = scmp.ne.s32.totalorder %s5877_s22, %s5488_s24  ;;  %s5493_s26 = sshll.u32 %s5676_s20, 4  ;;  %s5494_s26 = int_to_ptr.vmem [resolvable:$false] %s5493_s26 }
  0x53   : > { %s5495_s19 = scalar_lea.vmem %s5494_s26, 1024  ;;  %p5496_p2 = scmp.lt.s32.totalorder %s5877_s22, %s5494_s26 }
  0x54   : > { %p5491_p10 = pnand %p5489_p8, %p5887_p11  ;;  %p5497_p13 = scmp.lt.s32.totalorder %s5495_s19, %s5488_s24 }
  0x56   : > { %p5492_p0 = pneg %p5491_p10  ;;  %p5498_p3 = por %p5497_p13, %p5496_p2 }
  0x58   : > { %p5499_p6 = pnand %p5498_p3, %p5492_p0 }
  0x5a   : > { %5502 = shalt.err (!%p5499_p6)
}
  0x5b   : > { %s6889_s18 = smov 64   ;;  %s5677_s8 = smov [#allocation10]  }
  0x5c   : > { %5086 = dma.hbm_to_vmem [thread:$0]  (!%p5863_p4), %s5873_s10, 512, %s5877_s22, %s5881_s15, %s6889_s18, %s6889_s18, %s6863_s13  }
  0x5d   : > { %s437_s27 = sshll.u32 %s5677_s8, 4  ;;  %s5503_s24 = scalar_lea.hbm %s6841_s12, 9216  ;;  %s438_s27 = int_to_ptr.vmem [resolvable:$true] %s437_s27 }
  0x5e   : > { %p5504_p13 = scmp.ne.s32.totalorder %s6841_s12, %s5503_s24  ;;  %p6890_p2 = scmp.ne.s32.totalorder %s6881_s28, 0 }
  0x5f   : > { %p5510_p12 = scmp.lt.u32.totalorder %s5503_s24, %s6841_s12 }
  0x60   : > { %p6891_p1 = pneg %p6890_p2 }
  0x62   : > { %p5506_p7 = pnand %p5504_p13, %p6891_p1 }
  0x64   : > { %p5507_p9 = pneg %p5506_p7 }
  0x66   : > { %p5512_p5 = pnand %p5510_p12, %p5507_p9 }
  0x68   : > { %5515 = shalt.err (!%p5512_p5)
}
  0x69   : > { %s5516_s10 = scalar_lea.vmem %s438_s27, 9216  ;;  %p6892_p10 = pmov %p6891_p1 }
  0x6a   : > { %p5517_p8 = scmp.ne.s32.totalorder %s438_s27, %s5516_s10  ;;  %p5524_p6 = scmp.lt.s32.totalorder %s438_s27, %s438_s27 }
  0x6b   : > { %p5525_p4 = scmp.lt.s32.totalorder %s5516_s10, %s5516_s10 }
  0x6c   : > { %p5519_p0 = pnand %p5517_p8, %p6892_p10 }
  0x6d   : > { %p5526_p11 = por %p5525_p4, %p5524_p6 }
  0x6e   : > { %p5520_p3 = pneg %p5519_p0 }
  0x70   : > { %p5527_p1 = pnand %p5526_p11, %p5520_p3 }
  0x72   : > { %5530 = shalt.err (!%p5527_p1)
}
  0x73   : > { %5079 = dma.hbm_to_vmem [thread:$0]  (!%p6890_p2), %s6841_s12, 9216, %s438_s27, [#allocation11], %s6889_s18, %s6889_s18, %s6863_s13  }
  0x74   : > { %s6893_s11 = sshll.u32 %s5671_s16, 9  ;;  %s6894_s1 = sld [smem:[#allocation22_spill]] }
  0x75   : > { %s6895_s24 = sshll.u32 %s5830_s29, 5  ;;  %s4182_s19 = sshll.u32 %s5830_s29, 3 }
  0x76   : > { %s458_s28 = scalar_lea.vmem [#allocation2], %s6895_s24  ;;  %s455_s10 = scalar_lea.sflag [#allocation3], %s5830_s29 }
  0x77   : > { %s465_s26 = sshll.u32 %s458_s28, 4  ;;  %p6896_p11 = scmp.ne.s32.totalorder %s6888_s14, 0  ;;  %s5946_s26 = int_to_ptr.vmem [resolvable:$true] %s465_s26 }
  0x7a   : > { %s5942_s20 = scalar_lea.hbm %s6894_s1, %s6893_s11  ;;  %s5536_s11 = scalar_lea.hbm %s6894_s1, 1536 }
  0x7b   : > { %s5531_s3 = scalar_lea.hbm %s5942_s20, 512  ;;  %p5537_p7 = scmp.lt.u32.totalorder %s5942_s20, %s6894_s1 }
  0x7c   : > { %p5532_p4 = scmp.ne.s32.totalorder %s5942_s20, %s5531_s3  ;;  %p5538_p9 = scmp.lt.u32.totalorder %s5536_s11, %s5531_s3 }
  0x7d   : > { %p5540_p5 = scmp.lt.u32.totalorder %s5531_s3, %s5942_s20 }
  0x7e   : > { %p5534_p13 = pnand %p5532_p4, %p6896_p11  ;;  %p5539_p12 = por %p5538_p9, %p5537_p7 }
  0x80   : > { %p5535_p2 = pneg %p5534_p13  ;;  %p5541_p8 = por %p5540_p5, %p5539_p12 }
  0x82   : > { %p5542_p10 = pnand %p5541_p8, %p5535_p2 }
  0x84   : > { %5545 = shalt.err (!%p5542_p10)
}
  0x85   : > { %s5546_s24 = scalar_lea.vmem %s5946_s26, 512  ;;  %s5678_s28 = smov [#allocation2]  }
  0x86   : > { %p5547_p0 = scmp.ne.s32.totalorder %s5946_s26, %s5546_s24  ;;  %s5551_s27 = sshll.u32 %s5678_s28, 4  ;;  %s5552_s27 = int_to_ptr.vmem [resolvable:$false] %s5551_s27 }
  0x87   : > { %s5553_s5 = scalar_lea.vmem %s5552_s27, 1024  ;;  %p5554_p1 = scmp.lt.s32.totalorder %s5946_s26, %s5552_s27 }
  0x88   : > { %p5549_p3 = pnand %p5547_p0, %p6896_p11  ;;  %p5555_p4 = scmp.lt.s32.totalorder %s5553_s5, %s5546_s24 }
  0x8a   : > { %p5550_p6 = pneg %p5549_p3  ;;  %p5556_p13 = por %p5555_p4, %p5554_p1 }
  0x8c   : > { %p5557_p7 = pnand %p5556_p13, %p5550_p6 }
  0x8e   : > { %5560 = shalt.err (!%p5557_p7)
}
  0x8f   : > { %s5679_s3 = smov 128   ;;  %s5680_s11 = smov 8  }
  0x90   : > { %p6897_p2 = scmp.ne.s32.totalorder %s6885_s21, 0  ;;  %s4481_s22 = sshll.u32 %s5671_s16, 7 }
  0x91   : > { %s5977_s24 = scalar_lea.hbm %s6836_s7, %s4481_s22  ;;  %s532_s27 = scalar_lea.vmem [#allocation6], %s4182_s19 }
  0x92   : > { %5083 = dma.hbm_to_vmem [thread:$0]  (!%p6897_p2), %s5942_s20, 512, %s5946_s26, %s455_s10, %s5679_s3, %s5679_s3, %s5680_s11  }
  0x93   : > { %s539_s5 = sshll.u32 %s532_s27, 4  ;;  %s4185_s13 = sshll.u32 %s5830_s29, 4  ;;  %s5981_s5 = int_to_ptr.vmem [resolvable:$true] %s539_s5 }
  0x94   : > { %s5561_s1 = scalar_lea.hbm %s5977_s24, 128  ;;  %s5566_s10 = scalar_lea.hbm %s6836_s7, 384 }
  0x95   : > { %p5562_p9 = scmp.ne.s32.totalorder %s5977_s24, %s5561_s1  ;;  %p5567_p8 = scmp.lt.u32.totalorder %s5977_s24, %s6836_s7 }
  0x96   : > { %p5568_p10 = scmp.lt.u32.totalorder %s5566_s10, %s5561_s1  ;;  %p5570_p3 = scmp.lt.u32.totalorder %s5561_s1, %s5977_s24 }
  0x97   : > { %p5564_p12 = pnand %p5562_p9, %p6896_p11 }
  0x98   : > { %p5569_p0 = por %p5568_p10, %p5567_p8 }
  0x99   : > { %p5565_p5 = pneg %p5564_p12 }
  0x9a   : > { %p5571_p6 = por %p5570_p3, %p5569_p0 }
  0x9c   : > { %p5572_p1 = pnand %p5571_p6, %p5565_p5 }
  0x9e   : > { %5575 = shalt.err (!%p5572_p1)
}
  0x9f   : > { %s5576_s19 = scalar_lea.vmem %s5981_s5, 128  ;;  %s5681_s22 = smov [#allocation6]  }
  0xa0   : > { %p5577_p4 = scmp.ne.s32.totalorder %s5981_s5, %s5576_s19  ;;  %s5581_s8 = sshll.u32 %s5681_s22, 4  ;;  %s5582_s8 = int_to_ptr.vmem [resolvable:$false] %s5581_s8 }
  0xa1   : > { %s5583_s28 = scalar_lea.vmem %s5582_s8, 256  ;;  %p5584_p9 = scmp.lt.s32.totalorder %s5981_s5, %s5582_s8 }
  0xa2   : > { %p5579_p13 = pnand %p5577_p4, %p6896_p11  ;;  %p5585_p12 = scmp.lt.s32.totalorder %s5583_s28, %s5576_s19 }
  0xa4   : > { %p5580_p7 = pneg %p5579_p13  ;;  %p5586_p8 = por %p5585_p12, %p5584_p9 }
  0xa6   : > { %p5587_p10 = pnand %p5586_p8, %p5580_p7 }
  0xa8   : > { %5590 = shalt.err (!%p5587_p10)
}
  0xa9   : > { %s6898_s1 = smov 4   ;;  %s4482_s27 = sshll.u32 %s5671_s16, 8 }
  0xaa   : > { %5089 = dma.hbm_to_vmem [thread:$0]  (!%p6897_p2), %s5977_s24, 128, %s5981_s5, %s5881_s15, %s6889_s18, %s6889_s18, %s6898_s1  }
  0xab   : > { %s6013_s10 = scalar_lea.hbm %s6838_s9, %s4482_s27  ;;  %s561_s3 = scalar_lea.vmem [#allocation7], %s4185_s13 }
  0xac   : > { %s568_s11 = sshll.u32 %s561_s3, 4  ;;  %s6899_s19 = sand.u32 1, %s5671_s16   ;;  %s6017_s11 = int_to_ptr.vmem [resolvable:$true] %s568_s11 }
  0xad   : > { %s6021_s22 = scalar_lea.sflag [#allocation8], %s6899_s19  ;;  %s5591_s8 = scalar_lea.hbm %s6013_s10, 256 }
  0xae   : > { %p5592_p5 = scmp.ne.s32.totalorder %s6013_s10, %s5591_s8  ;;  %s5596_s29 = scalar_lea.hbm %s6838_s9, 768 }
  0xaf   : > { %p5597_p6 = scmp.lt.u32.totalorder %s6013_s10, %s6838_s9  ;;  %p5598_p1 = scmp.lt.u32.totalorder %s5596_s29, %s5591_s8 }
  0xb0   : > { %p5594_p0 = pnand %p5592_p5, %p6896_p11  ;;  %p5600_p13 = scmp.lt.u32.totalorder %s5591_s8, %s6013_s10 }
  0xb1   : > { %p5599_p4 = por %p5598_p1, %p5597_p6 }
  0xb2   : > { %p5595_p3 = pneg %p5594_p0 }
  0xb3   : > { %p5601_p7 = por %p5600_p13, %p5599_p4 }
  0xb5   : > { %p5602_p9 = pnand %p5601_p7, %p5595_p3 }
  0xb7   : > { %5605 = shalt.err (!%p5602_p9)
}
  0xb8   : > { %s5606_s16 = scalar_lea.vmem %s6017_s11, 256  ;;  %s5682_s13 = smov [#allocation7]  }
  0xb9   : > { %p5607_p12 = scmp.ne.s32.totalorder %s6017_s11, %s5606_s16  ;;  %s5611_s27 = sshll.u32 %s5682_s13, 4  ;;  %s5612_s27 = int_to_ptr.vmem [resolvable:$false] %s5611_s27 }
  0xba   : > { %s5613_s20 = scalar_lea.vmem %s5612_s27, 512  ;;  %p5614_p5 = scmp.lt.s32.totalorder %s6017_s11, %s5612_s27 }
  0xbb   : > { %p5609_p8 = pnand %p5607_p12, %p6896_p11  ;;  %p5615_p0 = scmp.lt.s32.totalorder %s5613_s20, %s5606_s16 }
  0xbd   : > { %p5610_p10 = pneg %p5609_p8  ;;  %p5616_p6 = por %p5615_p0, %p5614_p5 }
  0xbf   : > { %p5617_p1 = pnand %p5616_p6, %p5610_p10 }
  0xc1   : > { %5620 = shalt.err (!%p5617_p1)
}
  0xc2   : > { %5092 = dma.hbm_to_vmem [thread:$0]  (!%p6897_p2), %s6013_s10, 256, %s6017_s11, %s6021_s22, %s6889_s18, %s6889_s18, %s6898_s1  }
  0xc3   : > { %p6900_p11 = scmp.ne.s32.totalorder %s6880_s25, 0 }
  0xc4   : > { %s589_s14 = sand.u32 (!%p6900_p11), 1, %s5663_s30   ;;  %p6901_p3 = scmp.ne.s32.totalorder (!%p6900_p11), %s6877_s23, 0 }
  0xc5   : > { %587 = sbr.rel (%p6900_p11) target bundleno = 2361 (0x939), region = 76  ;;  %s6051_s26 = sshll.u32 (!%p6900_p11), %s589_s14, 5 }
  0xc6   : > { %s590_s3 = scalar_lea.sflag (!%p6900_p11), [#allocation3], %s589_s14  ;;  %s6054_s19 = scalar_lea.vmem (!%p6900_p11), [#allocation2], %s6051_s26 }
  0xcc   : > { %5638 = dma.done.wait (%p6901_p3), %s590_s3, 512  }
  0xcd   : > { %5640 = vsyncadd (%p6901_p3), %s590_s3, 4294966784  ;;  %s598_s21 = sand.u32 1, %s5783_s17   ;;  %s6062_s18 = scalar_lea.vmem [#allocation4], %s6051_s26 }
  0xce   : > { %s599_s25 = scalar_lea.sflag [#allocation5], %s598_s21 }
  0xcf   : > { %5642 = dma.done.wait (%p6901_p3), %s599_s25, 640  }
  0xd0   : > { %5644 = vsyncadd (%p6901_p3), %s599_s25, 4294966656  ;;  %s4191_s1 = sshll.u32 %s589_s14, 3  ;;  %s4192_s10 = sshll.u32 %s589_s14, 4 }
  0xd1   : > { %s6068_s11 = scalar_lea.vmem [#allocation6], %s4191_s1  ;;  %s617_s22 = scalar_lea.sflag [#allocation8], %s598_s21 }
  0xd2   : > { %s6070_s8 = scalar_lea.vmem [#allocation7], %s4192_s10 }
  0xd3   : > { %5646 = dma.done.wait (%p6901_p3), %s617_s22, 256  }
  0xd4   : > { %5648 = vsyncadd (%p6901_p3), %s617_s22, 4294967040  ;;  %p6902_p2 = scmp.eq.s32.totalorder %s5783_s17, 0 }
  0xd6   : > { %5650 = dma.done.wait (%p6902_p2), [#allocation8], 2304   ;;  %p6903_p4 = pmov %p6902_p2 }
  0xd7   : > { %p6904_p13 = pmov %p6902_p2 }
  0xd8   : > { %5652 = vsyncadd (%p6903_p4), [#allocation8], 4294964992 }
  0xd9   : > { %5654 = dma.done.wait (%p6904_p13), [#allocation11], 9216   ;;  %p6905_p7 = pmov %p6902_p2 }
  0xda   : > { %v5683_v0 = vmov 0   ;;  %v5144_v1 = vld [vmem:[%s6829_s0 + $0x40] sm:$0xff]   ;;  %v5146_v3 = vld [vmem:[%s6829_s0 + $0x48] sm:$0xff]   ;;  %v5148_v5 = vld [vmem:[%s6829_s0 + $0x50] sm:$0xff]   ;;  %p716_p9 = scmp.lt.s32.totalorder %s5783_s17, 2  ;;  %s6906_s25 = sld [smem:[#allocation23_spill]] }
  0xdb   : > { %5656 = vsyncadd (%p6905_p7), [#allocation11], 4294958080  ;;  %5142 = vset.pattern.permute.xlu0 %v5683_v0  ;;  %5143 = vset.pattern.permute.xlu1 %v5683_v0  ;;  %v5145_v2 = vld [vmem:[%s6829_s0] sm:$0xff]   ;;  %v5147_v4 = vld [vmem:[%s6829_s0 + $0x8] sm:$0xff]   ;;  %vm1015_vm0 = vcmask 261120   ;;  %vm5685_vm1 = vmmov 0  }
  0xdc   : > { %4489 = vmatprep.subr.bf16.mxu0 %v5144_v1  ;;  %v5149_v6 = vld [vmem:[%s6829_s0 + $0x10] sm:$0xff]   ;;  %v5150_v7 = vld [vmem:[%s6829_s0 + $0x58] sm:$0xff]   ;;  %s6107_s1 = scalar_select %p716_p9, %s5783_s17, 2  ;;  %v5152_v9 = vld [vmem:[%s6829_s0 + $0x60] sm:$0xff]   ;;  %vm1861_vm2 = vcmask 523264   ;;  %vm1864_vm3 = vcmask 785408  }
  0xdd   : > { %4490 = vmatpush3.bf16.msra.mxu0 %v5145_v2  ;;  %v5151_v8 = vld [vmem:[%s6829_s0 + $0x18] sm:$0xff]   ;;  %v5153_v10 = vld [vmem:[%s6829_s0 + $0x20] sm:$0xff]   ;;  %v5154_v11 = vld [vmem:[%s6829_s0 + $0x68] sm:$0xff]   ;;  %s5687_s29 = smov 96   ;;  %s5688_s16 = smov 64   ;;  %vm1887_vm4 = vcmask 130048  }
  0xde   : > { %4491 = vmatprep.subr.bf16.mxu0 %v5146_v3  ;;  %s4483_s24 = sshll.u32 %s6107_s1, 5  ;;  %v5162_v12 = vld [vmem:[%s6054_s19 + $0x4] ss:$8 sps:$4 sm:$0xff]   ;;  %v5156_v16 = vld [vmem:[%s6829_s0 + $0x70] sm:$0xff]   ;;  %s6139_s5 = sshll.u32 %s6107_s1, 4  ;;  %v5158_v20 = vld [vmem:[%s6829_s0 + $0x78] sm:$0xff]  }
  0xdf   : > { %s720_s13 = scalar_lea.vmem %s6831_s2, %s4483_s24  ;;  %v5155_v14 = vld [vmem:[%s6829_s0 + $0x28] sm:$0xff]   ;;  %954 = vmatprep.mubr.bf16.mxu0 %v5162_v12  ;;  %s730_s15 = scalar_lea.vmem %s6833_s4, %s4483_s24  ;;  %v5157_v17 = vld [vmem:[%s6829_s0 + $0x30] sm:$0xff]   ;;  %v5159_v23 = vld [vmem:[%s6829_s0 + $0x38] sm:$0xff]  }
  0xe0   : > { %v782_v13 = vld [vmem:[%s720_s13] sm:$0xff]  ;;  %v784_v15 = vld [vmem:[%s720_s13 + $0x10] sm:$0xff]  ;;  %v783_v18 = vld [vmem:[%s720_s13 + $0x8] sm:$0xff]  ;;  %s735_s14 = scalar_lea.vmem %s6835_s6, %s6139_s5  ;;  %s6158_s10 = scalar_lea.vmem %s6906_s25, %s6139_s5 }
  0xe1   : > { %4492 = vmatpush3.bf16.msra.mxu0 %v5147_v4  ;;  %788 = vperm.xlu0 %5142, %v782_v13   ;;  %v785_v19 = vld [vmem:[%s720_s13 + $0x18] sm:$0xff]  ;;  %v981_v21 = vld [vmem:[%s730_s15] sm:$0xff]  ;;  %v982_v22 = vld [vmem:[%s730_s15 + $0x8] sm:$0xff]  ;;  %s4206_s28 = sshll.u32 %s6107_s1, 3  ;;  %s6909_s20 = sld [smem:[#allocation28_spill]] }
  0xe2   : > { %4493 = vmatprep.subr.bf16.mxu0 %v5148_v5  ;;  %798 = vperm.xlu1 %5143, %v784_v15   ;;  %v983_v24 = vld [vmem:[%s730_s15 + $0x10] sm:$0xff]  ;;  %v5160_v25 = vld [vmem:[%s6054_s19] ss:$8 sps:$4 sm:$0xff]   ;;  %v984_v26 = vld [vmem:[%s730_s15 + $0x18] sm:$0xff]  ;;  %s6907_s15 = sld [smem:[#allocation25_spill]]  ;;  %s715_s24 = scalar_lea.vmem [#allocation12], %s6051_s26 }
  0xe3   : > { %v5163_v27 = vld [vmem:[%s6054_s19 + $0x14] ss:$8 sps:$4 sm:$0xff]   ;;  %v1628_v28 = vld [vmem:[%s735_s14] sm:$0xff]  ;;  %v1629_v29 = vld [vmem:[%s735_s14 + $0x8] sm:$0xff]  ;;  %s6910_s27 = sld [smem:[#allocation21_spill]] }
  0xe4   : > { %v5165_v30 = vld [vmem:[%s6054_s19 + $0x10] ss:$8 sps:$4 sm:$0xff]   ;;  %v5166_v31 = vld [vmem:[%s6158_s10] sm:$0xff]   ;;  %v5167_v58 = vld [vmem:[%s6158_s10 + $0x8] sm:$0xff]   ;;  %s5686_s19 = smov 32  }
  0xe5   : > { %4494 = vmatpush3.bf16.msra.mxu0 %v5149_v6  ;;  %793 = vperm.xlu0 %5142, %v783_v18   ;;  %v5168_v59 = vld [vmem:[#allocation9] sm:$0xff]   ;;  %v5169_v60 = vld [vmem:[#allocation9 + $0x50] sm:$0xff]   ;;  %v5170_v61 = vld [vmem:[#allocation9 + $0x8] sm:$0xff]  }
  0xe6   : > { %4495 = vmatprep.subr.bf16.mxu0 %v5150_v7  ;;  %803 = vperm.xlu1 %5143, %v785_v19   ;;  %v5171_v62 = vld [vmem:[#allocation9 + $0x58] sm:$0xff]   ;;  %v5172_v63 = vld [vmem:[#allocation9 + $0x10] sm:$0xff]  }
  0xe7   : > { %4687 = vmatprep.mubr.msk.bf16.mxu1 %vm1015_vm0, %v5166_v31  ;;  %v5173_v0 = vld [vmem:[#allocation9 + $0x70] sm:$0xff]   ;;  %v5174_v19 = vld [vmem:[#allocation9 + $0x18] sm:$0xff]  }
  0xe8   : > { %s740_s23 = scalar_lea.vmem %s6907_s15, %s6139_s5  ;;  %s6908_s5 = sld [smem:[#allocation26_spill]] }
  0xe9   : > { %4496 = vmatpush3.bf16.msra.mxu0 %v5151_v8  ;;  %987 = vperm.xlu0 %5142, %v981_v21   ;;  %v5176_v21 = vld [vmem:[#allocation9 + $0x20] sm:$0xff]   ;;  %p6911_p12 = scmp.ne.s32.totalorder %s6910_s27, 0 }
  0xea   : > { %4497 = vmatprep.subr.bf16.mxu0 %v5152_v9  ;;  %992 = vperm.xlu1 %5143, %v982_v22   ;;  %v5684_v22 = vmov 0.0  }
  0xed   : > { %4498 = vmatpush3.bf16.msra.mxu0 %v5153_v10  ;;  %997 = vperm.xlu0 %5142, %v983_v24   ;;  %v5178_v24 = vld [vmem:[#allocation9 + $0x30] sm:$0xff]  }
  0xee   : > { %4499 = vmatprep.subr.bf16.mxu0 %v5154_v11  ;;  %1002 = vperm.xlu1 %5143, %v984_v26   ;;  %v5180_v26 = vld [vmem:[#allocation9 + $0x60] sm:$0xff]   ;;  %s744_s13 = scalar_lea.vmem %s6908_s5, %s4206_s28  ;;  %s4488_s5 = sshll.u32 (%p6911_p12), %s5783_s17, 4 }
  0xf1   : > { %4500 = vmatpush3.bf16.msra.mxu0 %v5155_v14  ;;  %1632 = vperm.xlu0 %5142, %v1628_v28   ;;  %v5182_v28 = vld [vmem:[#allocation9 + $0x80] sm:$0xff]  }
  0xf2   : > { %4501 = vmatprep.subr.bf16.mxu0 %v5156_v16  ;;  %1637 = vperm.xlu1 %5143, %v1629_v29   ;;  %v5183_v29 = vld [vmem:[#allocation9 + $0x88] sm:$0xff]  }
  0xf5   : > { %4502 = vmatpush3.bf16.msra.mxu0 %v5157_v17 }
  0xf6   : > { %4503 = vmatprep.subr.bf16.mxu0 %v5158_v20  ;;  %v5175_v20 = vld [vmem:[#allocation9 + $0x78] sm:$0xff]  }
  0xf9   : > { %4504 = vmatpush3.bf16.msra.mxu0 %v5159_v23  ;;  %v5177_v23 = vld [vmem:[#allocation9 + $0x28] sm:$0xff]  }
  0xfa   : > { %4723 = vmatprep.subr.bf16.mxu0 %v5169_v60 }
  0xfc   : > { %955 = vmatmul.mubr.bf16.vlgmr.msra.gmra.mrb[0].mxu0 %v5160_v25  ;;  %v5179_v25 = vld [vmem:[#allocation9 + $0x38] sm:$0xff]  }
  0xfd   : > { %962 = vmatprep.mubr.bf16.mxu0 %v5163_v27  ;;  %4724 = vmatpush3.bf16.msra.mxu0 %v5169_v60  ;;  %v5181_v27 = vld [vmem:[#allocation9 + $0x68] sm:$0xff]  }
  0xfe   : > { %4725 = vmatprep.subr.bf16.mxu0 %v5171_v62 }
 0x101   : > { %4726 = vmatpush3.bf16.msra.mxu0 %v5171_v62  ;;  %v5184_v62 = vld [vmem:[%s6062_s18 + $0x8] sm:$0xff]  }
 0x102   : > { %4739 = vmatprep.subr.bf16.mxu0 %v5173_v0 }
 0x104   : > { %963 = vmatmul.mubr.bf16.gmra.mrb[4].mxu0 %v5165_v30 }
 0x160   : > { %v789_v32 = vpop.permute.xlu0 %788 }
 0x161   : > { %v799_v42 = vpop.permute.xlu1 %798 }
 0x164   : > { %v794_v40 = vpop.permute.xlu0 %793 }
 0x165   : > { %v804_v53 = vpop.permute.xlu1 %803 }
 0x168   : > { %v988_v1 = vpop.permute.xlu0 %987 }
 0x169   : > { %v993_v2 = vpop.permute.xlu1 %992 }
 0x16c   : > { %v998_v3 = vpop.permute.xlu0 %997 }
 0x16d   : > { %v1003_v7 = vpop.permute.xlu1 %1002 }
 0x1cf   : > { %v4505_v33 = vpop.f32.mrb[0].mxu0 }
 0x1d0   : > { %v4506_v34 = vpop.f32.mrb[1].mxu0 }
 0x1d1   : > { %v4507_v35 = vadd.f32 %v4506_v34, %v4505_v33  ;;  %v4508_v36 = vpop.f32.mrb[2].mxu0 }
 0x1d2   : > { %v4509_v37 = vpop.f32.mrb[3].mxu0 }
 0x1d3   : > { %v957_v38 = vadd.f32 %v4507_v35, %v789_v32  ;;  %v4510_v39 = vadd.f32 %v4509_v37, %v4508_v36 }
 0x1d5   : > { %v960_v41 = vadd.f32 %v4510_v39, %v794_v40  ;;  %v971_v43 = vmax.f32 %v957_v38, 0.0 }
 0x1d7   : > { %v972_v44 = vmax.f32 %v960_v41, 0.0  ;;  %v4511_v45 = vpop.f32.mrb[4].mxu0 }
 0x1d8   : > { %v4512_v46 = vpop.f32.mrb[5].mxu0 }
 0x1d9   : > { %v4513_v47 = vadd.f32 %v4512_v46, %v4511_v45  ;;  %v4514_v48 = vpop.f32.mrb[6].mxu0  ;;  %v975_v49 = vpack.c.bf16 %v972_v44, %v971_v43 }
 0x1da   : > { %v4515_v50 = vpop.f32.mrb[7].mxu0 }
 0x1db   : > { %v965_v51 = vadd.f32 %v4513_v47, %v799_v42  ;;  %v4516_v52 = vadd.f32 %v4515_v50, %v4514_v48  ;;  %4683 = vmatprep.subr.bf16.mxu1 %v975_v49 }
 0x1dc   : > { %4684 = vmatpush3.bf16.msra.mxu1 %v975_v49 }
 0x1dd   : > { %v968_v54 = vadd.f32 %v4516_v52, %v804_v53  ;;  %v973_v55 = vmax.f32 %v965_v51, 0.0 }
 0x1df   : > { %v974_v56 = vmax.f32 %v968_v54, 0.0 }
 0x1e1   : > { %v976_v57 = vpack.c.bf16 %v974_v56, %v973_v55 }
 0x1e3   : > { %4685 = vmatprep.subr.bf16.mxu1 %v976_v57 }
 0x1e4   : > { %4686 = vmatpush3.bf16.msra.mxu1 %v976_v57 }
 0x1e5   : > { %4691 = vmatprep.subr.bf16.mxu1 %v5168_v59 }
 0x1e7   : > { %4688 = vmatmul.mubr.msk.bf16.vlgmr.msra.gmra.mrb[0].mxu1 %vm1015_vm0, %v5167_v58 }
 0x1e8   : > { %4692 = vmatpush3.bf16.msra.mxu1 %v5168_v59 }
 0x1e9   : > { %4693 = vmatprep.subr.bf16.mxu1 %v5170_v61 }
 0x1ec   : > { %4694 = vmatpush3.bf16.msra.mxu1 %v5170_v61 }
 0x1ed   : > { %4699 = vmatprep.subr.bf16.mxu1 %v5172_v63 }
 0x2ba   : > { %v4689_v4 = vpop.f32.mrb[0].mxu1 }
 0x2bb   : > { %v1065_v5 = vadd.f32 %v4689_v4, %v998_v3  ;;  %v1056_v6 = vpop.f32.mrb[1].mxu1 }
 0x2bc   : > { %v1057_v8 = vadd.f32 %v1056_v6, %v988_v1  ;;  %v4690_v9 = vpop.f32.mrb[2].mxu1 }
 0x2bd   : > { %v1068_v10 = vadd.f32 %v4690_v9, %v1003_v7  ;;  %v1059_v11 = vpop.f32.mrb[3].mxu1  ;;  %v1073_v13 = vmax.f32 %v1065_v5, 0.0 }
 0x2be   : > { %v1060_v12 = vadd.f32 %v1059_v11, %v993_v2  ;;  %v1071_v15 = vmax.f32 %v1057_v8, 0.0 }
 0x2bf   : > { %v1074_v14 = vmax.f32 %v1068_v10, 0.0 }
 0x2c0   : > { %v1072_v16 = vmax.f32 %v1060_v12, 0.0 }
 0x2c1   : > { %v6164_v17 = vpack.c.bf16 %v1074_v14, %v1073_v13 }
 0x2c2   : > { %v6166_v18 = vpack.c.bf16 %v1072_v16, %v1071_v15  ;;  %v5185_v15 = vld [vmem:[%s6062_s18] sm:$0xff]   ;;  %v5186_v16 = vld [vmem:[%s6062_s18 + $0x18] sm:$0xff]  }
 0x2c4   : > { %4695 = vmatprep.mubr.msk.bf16.mxu1 %vm1015_vm0, %v6166_v18  ;;  %4727 = vmatprep.mubr.msk.bf16.mxu0 %vm1015_vm0, %v6166_v18 }
 0x2c5   : > { %4696 = vmatmul.mubr.msk.bf16.vlgmr.msra.gmra.mrb[4].mxu1 %vm1015_vm0, %v6164_v17  ;;  %4728 = vmatmul.mubr.msk.bf16.vlgmr.msra.gmra.mrb[8].mxu0 %vm1015_vm0, %v6164_v17 }
 0x2c6   : > { %4700 = vmatpush3.bf16.msra.mxu1 %v5172_v63  ;;  %4740 = vmatpush3.bf16.msra.mxu0 %v5173_v0 }
 0x2c7   : > { %4703 = vmatprep.mubr.msk.bf16.mxu1 %vm1015_vm0, %v6166_v18  ;;  %4743 = vmatprep.mubr.msk.bf16.mxu0 %vm1015_vm0, %v6166_v18 }
 0x2c8   : > { %4701 = vmatprep.subr.bf16.mxu1 %v5174_v19  ;;  %4741 = vmatprep.subr.bf16.mxu0 %v5175_v20 }
 0x2ca   : > { %4702 = vmatpush3.bf16.msra.mxu1 %v5174_v19  ;;  %4742 = vmatpush3.bf16.msra.mxu0 %v5175_v20 }
 0x2cb   : > { %4707 = vmatprep.subr.bf16.mxu1 %v5176_v21  ;;  %4755 = vmatprep.subr.bf16.mxu0 %v5684_v22 }
 0x2cd   : > { %4704 = vmatmul.mubr.msk.bf16.vlgmr.msra.gmra.mrb[8].mxu1 %vm1015_vm0, %v6164_v17  ;;  %4744 = vmatmul.mubr.msk.bf16.vlgmr.msra.gmra.mrb[12].mxu0 %vm1015_vm0, %v6164_v17 }
 0x2ce   : > { %4708 = vmatpush3.bf16.msra.mxu1 %v5176_v21  ;;  %4756 = vmatpush3.bf16.msra.mxu0 %v6166_v18 }
 0x2cf   : > { %4711 = vmatprep.mubr.msk.bf16.mxu1 %vm1015_vm0, %v6166_v18  ;;  %4709 = vmatprep.subr.bf16.mxu1 %v5177_v23 }
 0x2d0   : > { %4757 = vmatprep.subr.bf16.mxu0 %v5684_v22  ;;  %4771 = vmatprep.mubr.msk.bf16.mxu0 %vm5685_vm1, %v5684_v22 }
 0x2d2   : > { %4710 = vmatpush3.bf16.msra.mxu1 %v5177_v23  ;;  %4758 = vmatpush3.bf16.msra.mxu0 %v6164_v17  ;;  %v1638_v23 = vpop.permute.xlu1 %1637 }
 0x2d3   : > { %4715 = vmatprep.subr.bf16.mxu1 %v5178_v24  ;;  %4759 = vmatprep.subr.bf16.mxu0 %v5684_v22 }
 0x2d5   : > { %4712 = vmatmul.mubr.msk.bf16.vlgmr.msra.gmra.mrb[12].mxu1 %vm1015_vm0, %v6164_v17 }
 0x2d6   : > { %4716 = vmatpush3.bf16.msra.mxu1 %v5178_v24  ;;  %4719 = vmatprep.mubr.msk.bf16.mxu1 %vm1015_vm0, %v6166_v18 }
 0x2d7   : > { %4717 = vmatprep.subr.bf16.mxu1 %v5179_v25 }
 0x2da   : > { %4718 = vmatpush3.bf16.msra.mxu1 %v5179_v25 }
 0x2db   : > { %4731 = vmatprep.subr.bf16.mxu1 %v5180_v26 }
 0x2dd   : > { %4720 = vmatmul.mubr.msk.bf16.vlgmr.msra.gmra.mrb[16].mxu1 %vm1015_vm0, %v6164_v17 }
 0x2de   : > { %4732 = vmatpush3.bf16.msra.mxu1 %v5180_v26  ;;  %4735 = vmatprep.mubr.msk.bf16.mxu1 %vm1015_vm0, %v6166_v18 }
 0x2df   : > { %4733 = vmatprep.subr.bf16.mxu1 %v5181_v27 }
 0x2e2   : > { %4734 = vmatpush3.bf16.msra.mxu1 %v5181_v27 }
 0x2e3   : > { %4747 = vmatprep.subr.bf16.mxu1 %v5182_v28 }
 0x2e5   : > { %4736 = vmatmul.mubr.msk.bf16.vlgmr.msra.gmra.mrb[20].mxu1 %vm1015_vm0, %v6164_v17 }
 0x2e6   : > { %4748 = vmatpush3.bf16.msra.mxu1 %v5182_v28  ;;  %4751 = vmatprep.mubr.msk.bf16.mxu1 %vm1015_vm0, %v6166_v18 }
 0x2e7   : > { %4749 = vmatprep.subr.bf16.mxu1 %v5183_v29 }
 0x2ea   : > { %4750 = vmatpush3.bf16.msra.mxu1 %v5183_v29 }
 0x2eb   : > { %4775 = vmatprep.subr.bf16.mxu1 %v5684_v22 }
 0x2ed   : > { %4752 = vmatmul.mubr.msk.bf16.vlgmr.msra.gmra.mrb[24].mxu1 %vm1015_vm0, %v6164_v17 }
 0x2ee   : > { %4776 = vmatpush3.bf16.msra.mxu1 %v6166_v18  ;;  %4791 = vmatprep.mubr.msk.bf16.mxu1 %vm5685_vm1, %v5684_v22 }
 0x2ef   : > { %4777 = vmatprep.subr.bf16.mxu1 %v5684_v22 }
 0x2f2   : > { %4778 = vmatpush3.bf16.msra.mxu1 %v6164_v17 }
 0x2f3   : > { %4779 = vmatprep.subr.bf16.mxu1 %v5684_v22 }
 0x398   : > { %v6214_v30 = vpop.f32.mrb[4].mxu1  ;;  %v4729_v31 = vpop.f32.mrb[8].mxu0 }
 0x399   : > { %v6216_v32 = vpop.f32.mrb[5].mxu1  ;;  %v1405_v33 = vpop.f32.mrb[9].mxu0 }
 0x39a   : > { %v6218_v34 = vpop.f32.mrb[6].mxu1  ;;  %v4730_v35 = vpop.f32.mrb[10].mxu0 }
 0x39b   : > { %v1149_v36 = vpack.c.bf16 %v6218_v34, %v6214_v30  ;;  %v6222_v37 = vpack.c.bf16 %v4730_v35, %v4729_v31  ;;  %v6224_v38 = vpop.f32.mrb[7].mxu1  ;;  %v1408_v39 = vpop.f32.mrb[11].mxu0 }
 0x39c   : > { %v1148_v40 = vpack.c.bf16 %v6224_v38, %v6216_v32  ;;  %v1420_v41 = vpack.c.bf16 %v1408_v39, %v1405_v33 }
 0x39e   : > { %4780 = vmatpush3.bf16.msra.mxu1 %v1420_v41 }
 0x39f   : > { %4781 = vmatprep.subr.bf16.mxu1 %v5684_v22 }
 0x3a0   : > { %v4705_v42 = vpop.f32.mrb[8].mxu1  ;;  %v4745_v43 = vpop.f32.mrb[12].mxu0 }
 0x3a1   : > { %v1201_v44 = vpop.f32.mrb[9].mxu1  ;;  %v1541_v45 = vpop.f32.mrb[13].mxu0 }
 0x3a2   : > { %v4706_v46 = vpop.f32.mrb[10].mxu1  ;;  %v4746_v47 = vpop.f32.mrb[14].mxu0  ;;  %4782 = vmatpush3.bf16.msra.mxu1 %v6222_v37 }
 0x3a3   : > { %v1217_v48 = vpack.c.bf16 %v4706_v46, %v4705_v42  ;;  %v6230_v49 = vpack.c.bf16 %v4746_v47, %v4745_v43  ;;  %v1204_v50 = vpop.f32.mrb[11].mxu1  ;;  %v1544_v51 = vpop.f32.mrb[15].mxu0  ;;  %4783 = vmatprep.subr.bf16.mxu1 %v5684_v22 }
 0x3a4   : > { %v1216_v52 = vpack.c.bf16 %v1204_v50, %v1201_v44  ;;  %v6233_v53 = vpack.c.bf16 %v1544_v51, %v1541_v45 }
 0x3a6   : > { %4784 = vmatpush3.bf16.msra.mxu1 %v1216_v52 }
 0x3a7   : > { %4785 = vmatprep.subr.bf16.mxu1 %v5684_v22 }
 0x3a8   : > { %v4713_v54 = vpop.f32.mrb[12].mxu1 }
 0x3a9   : > { %v1269_v55 = vpop.f32.mrb[13].mxu1 }
 0x3aa   : > { %v4714_v56 = vpop.f32.mrb[14].mxu1  ;;  %4786 = vmatpush3.bf16.msra.mxu1 %v1217_v48 }
 0x3ab   : > { %v1285_v57 = vpack.c.bf16 %v4714_v56, %v4713_v54  ;;  %v1272_v58 = vpop.f32.mrb[15].mxu1  ;;  %4787 = vmatprep.subr.bf16.mxu1 %v5684_v22 }
 0x3ac   : > { %v1284_v59 = vpack.c.bf16 %v1272_v58, %v1269_v55  ;;  %v1870_v58 = vld [vmem:[%s740_s23] sm:$0xff] }
 0x3ae   : > { %4788 = vmatpush3.bf16.msra.mxu1 %v1284_v59  ;;  %v2791_v59 = vld [vmem:[%s744_s13] sm:$0xff] }
 0x3af   : > { %4789 = vmatprep.subr.bf16.mxu1 %v5684_v22 }
 0x3b0   : > { %v4721_v60 = vpop.f32.mrb[16].mxu1 }
 0x3b1   : > { %v1337_v61 = vpop.f32.mrb[17].mxu1 }
 0x3b2   : > { %v4722_v63 = vpop.f32.mrb[18].mxu1  ;;  %4790 = vmatpush3.bf16.msra.mxu1 %v1285_v57 }
 0x3b3   : > { %v1353_v0 = vpack.c.bf16 %v4722_v63, %v4721_v60  ;;  %v1340_v1 = vpop.f32.mrb[19].mxu1  ;;  %4815 = vmatprep.subr.bf16.mxu1 %v5684_v22  ;;  %v5189_v60 = vld [vmem:[#allocation10] sm:$0xff]   ;;  %v5195_v63 = vld [vmem:[#allocation10 + $0x18] sm:$0xff]  }
 0x3b4   : > { %v1352_v2 = vpack.c.bf16 %v1340_v1, %v1337_v61  ;;  %v5191_v61 = vld [vmem:[#allocation10 + $0x8] sm:$0xff]  }
 0x3b5   : > { %4792 = vmatmul.mubr.bf16.vlgmr.msra.gmra.mrb[28].mxu1 %v5184_v62  ;;  %v5193_v62 = vld [vmem:[#allocation10 + $0x10] sm:$0xff]   ;;  %v5199_v1 = vld [vmem:[#allocation10 + $0x28] sm:$0xff]  }
 0x3b6   : > { %4760 = vmatpush3.bf16.msra.mxu0 %v1352_v2  ;;  %4816 = vmatpush3.bf16.msra.mxu1 %v6166_v18 }
 0x3b7   : > { %4761 = vmatprep.subr.bf16.mxu0 %v5684_v22  ;;  %4817 = vmatprep.subr.bf16.mxu1 %v5684_v22 }
 0x3b8   : > { %v4737_v3 = vpop.f32.mrb[20].mxu1  ;;  %4831 = vmatprep.mubr.msk.bf16.mxu1 %vm5685_vm1, %v5684_v22 }
 0x3b9   : > { %v1473_v4 = vpop.f32.mrb[21].mxu1 }
 0x3ba   : > { %v4738_v5 = vpop.f32.mrb[22].mxu1  ;;  %4762 = vmatpush3.bf16.msra.mxu0 %v1353_v0  ;;  %4818 = vmatpush3.bf16.msra.mxu1 %v6164_v17 }
 0x3bb   : > { %v1489_v6 = vpack.c.bf16 %v4738_v5, %v4737_v3  ;;  %v1476_v7 = vpop.f32.mrb[23].mxu1  ;;  %4763 = vmatprep.subr.bf16.mxu0 %v5684_v22  ;;  %4819 = vmatprep.subr.bf16.mxu1 %v5684_v22 }
 0x3bc   : > { %v1488_v8 = vpack.c.bf16 %v1476_v7, %v1473_v4 }
 0x3be   : > { %4764 = vmatpush3.bf16.msra.mxu0 %v1216_v52  ;;  %4820 = vmatpush3.bf16.msra.mxu1 %v1420_v41 }
 0x3bf   : > { %4765 = vmatprep.subr.bf16.mxu0 %v5684_v22  ;;  %4821 = vmatprep.subr.bf16.mxu1 %v5684_v22 }
 0x3c0   : > { %v4753_v9 = vpop.f32.mrb[24].mxu1 }
 0x3c1   : > { %v1609_v10 = vpop.f32.mrb[25].mxu1 }
 0x3c2   : > { %v4754_v11 = vpop.f32.mrb[26].mxu1  ;;  %4766 = vmatpush3.bf16.msra.mxu0 %v1217_v48  ;;  %4822 = vmatpush3.bf16.msra.mxu1 %v6222_v37  ;;  %v1871_v48 = vld [vmem:[%s740_s23 + $0x8] sm:$0xff] }
 0x3c3   : > { %v1625_v12 = vpack.c.bf16 %v4754_v11, %v4753_v9  ;;  %v1612_v13 = vpop.f32.mrb[27].mxu1  ;;  %4767 = vmatprep.subr.bf16.mxu0 %v5684_v22  ;;  %4823 = vmatprep.subr.bf16.mxu1 %v5684_v22  ;;  %v5190_v9 = vld [vmem:[#allocation10 + $0x40] sm:$0xff]   ;;  %v5194_v11 = vld [vmem:[#allocation10 + $0x50] sm:$0xff]  }
 0x3c4   : > { %v1624_v14 = vpack.c.bf16 %v1612_v13, %v1609_v10  ;;  %v5192_v10 = vld [vmem:[#allocation10 + $0x48] sm:$0xff]   ;;  %v5198_v13 = vld [vmem:[#allocation10 + $0x60] sm:$0xff]  }
 0x3c6   : > { %4768 = vmatpush3.bf16.msra.mxu0 %v1148_v40  ;;  %4824 = vmatpush3.bf16.msra.mxu1 %v6233_v53 }
 0x3c7   : > { %4769 = vmatprep.subr.bf16.mxu0 %v5684_v22  ;;  %4825 = vmatprep.subr.bf16.mxu1 %v5684_v22 }
 0x3ca   : > { %4770 = vmatpush3.bf16.msra.mxu0 %v1149_v36  ;;  %4826 = vmatpush3.bf16.msra.mxu1 %v6230_v49 }
 0x3cb   : > { %4795 = vmatprep.subr.bf16.mxu0 %v5684_v22  ;;  %4827 = vmatprep.subr.bf16.mxu1 %v5684_v22 }
 0x3cd   : > { %4772 = vmatmul.mubr.bf16.vlgmr.msra.gmra.mrb[16].mxu0 %v5185_v15  ;;  %v5201_v15 = vld [vmem:[#allocation10 + $0x30] sm:$0xff]  }
 0x3ce   : > { %4796 = vmatpush3.bf16.msra.mxu0 %v6166_v18  ;;  %4828 = vmatpush3.bf16.msra.mxu1 %v1624_v14  ;;  %v1633_v18 = vpop.permute.xlu0 %1632  ;;  %v5200_v14 = vld [vmem:[#allocation10 + $0x68] sm:$0xff]  }
 0x3cf   : > { %4797 = vmatprep.subr.bf16.mxu0 %v5684_v22  ;;  %4829 = vmatprep.subr.bf16.mxu1 %v5684_v22 }
 0x3d0   : > { %4811 = vmatprep.mubr.msk.bf16.mxu0 %vm5685_vm1, %v5684_v22 }
 0x3d2   : > { %4798 = vmatpush3.bf16.msra.mxu0 %v6164_v17  ;;  %4830 = vmatpush3.bf16.msra.mxu1 %v1625_v12  ;;  %v5187_v17 = vld [vmem:[%s6062_s18 + $0x10] sm:$0xff]   ;;  %v5196_v12 = vld [vmem:[#allocation10 + $0x58] sm:$0xff]  }
 0x3d3   : > { %4799 = vmatprep.subr.bf16.mxu0 %v5684_v22  ;;  %4841 = vmatprep.subr.bf16.mxu1 %v5684_v22 }
 0x3d5   : > { %4832 = vmatmul.mubr.bf16.vlgmr.msra.gmra.mrb[32].mxu1 %v5186_v16  ;;  %v5202_v16 = vld [vmem:[#allocation10 + $0x70] sm:$0xff]  }
 0x3d6   : > { %4800 = vmatpush3.bf16.msra.mxu0 %v1352_v2  ;;  %4857 = vmatprep.mubr.msk.bf16.mxu1 %vm5685_vm1, %v5684_v22 }
 0x3d7   : > { %4801 = vmatprep.subr.bf16.mxu0 %v5684_v22  ;;  %4842 = vmatpush3.bf16.msra.mxu1 %v5189_v60  ;;  %v5234_v60 = vld [vmem:[#allocation10 + $0x1b0] sm:$0xff]  }
 0x3d8   : > { %4843 = vmatprep.subr.bf16.mxu1 %v5684_v22 }
 0x3da   : > { %4802 = vmatpush3.bf16.msra.mxu0 %v1353_v0  ;;  %v5197_v0 = vld [vmem:[#allocation10 + $0x20] sm:$0xff]  }
 0x3db   : > { %4803 = vmatprep.subr.bf16.mxu0 %v5684_v22  ;;  %4844 = vmatpush3.bf16.msra.mxu1 %v5191_v61  ;;  %v5235_v61 = vld [vmem:[#allocation10 + $0x178] sm:$0xff]  }
 0x3dc   : > { %4845 = vmatprep.subr.bf16.mxu1 %v5684_v22 }
 0x3de   : > { %4804 = vmatpush3.bf16.msra.mxu0 %v6233_v53 }
 0x3df   : > { %4805 = vmatprep.subr.bf16.mxu0 %v5684_v22  ;;  %4846 = vmatpush3.bf16.msra.mxu1 %v5193_v62  ;;  %v5236_v62 = vld [vmem:[#allocation10 + $0x1b8] sm:$0xff]  }
 0x3e0   : > { %4847 = vmatprep.subr.bf16.mxu1 %v5684_v22 }
 0x3e2   : > { %4806 = vmatpush3.bf16.msra.mxu0 %v6230_v49 }
 0x3e3   : > { %4807 = vmatprep.subr.bf16.mxu0 %v5684_v22  ;;  %4848 = vmatpush3.bf16.msra.mxu1 %v5195_v63  ;;  %v5237_v63 = vld [vmem:[#allocation10 + $0x1c0] sm:$0xff]  }
 0x3e4   : > { %4849 = vmatprep.subr.bf16.mxu1 %v5684_v22 }
 0x3e6   : > { %4808 = vmatpush3.bf16.msra.mxu0 %v1488_v8  ;;  %v5188_v8 = vld [vmem:[%s6068_s11] sm:$0xff]   ;;  %s6912_s11 = sld [smem:[#allocation29_spill]] (%p6911_p12) }
 0x3e7   : > { %4809 = vmatprep.subr.bf16.mxu0 %v5684_v22  ;;  %4850 = vmatpush3.bf16.msra.mxu1 %v5197_v0  ;;  %v5238_v0 = vld [vmem:[#allocation10 + $0x200] sm:$0xff]  }
 0x3e8   : > { %4851 = vmatprep.subr.bf16.mxu1 %v5684_v22 }
 0x3ea   : > { %4810 = vmatpush3.bf16.msra.mxu0 %v1489_v6 }
 0x3eb   : > { %4835 = vmatprep.subr.bf16.mxu0 %v5684_v22  ;;  %4852 = vmatpush3.bf16.msra.mxu1 %v5199_v1  ;;  %v5239_v1 = vld [vmem:[#allocation10 + $0x1c8] sm:$0xff]  }
 0x3ec   : > { %4853 = vmatprep.subr.bf16.mxu1 %v5684_v22  ;;  %s3928_s1 = scalar_lea.vmem (%p6911_p12), %s6912_s11, %s4488_s5 }
 0x3ed   : > { %4812 = vmatmul.mubr.bf16.vlgmr.msra.gmra.mrb[20].mxu0 %v5187_v17  ;;  %v5203_v17 = vld [vmem:[#allocation10 + $0x38] sm:$0xff]  }
 0x3ee   : > { %4837 = vmatprep.mubr.msk.bf16.mxu0 %vm5685_vm1, %v5684_v22 }
 0x3ef   : > { %4854 = vmatpush3.bf16.msra.mxu1 %v5201_v15 }
 0x3f0   : > { %4855 = vmatprep.subr.bf16.mxu1 %v5684_v22 }
 0x3f3   : > { %4856 = vmatpush3.bf16.msra.mxu1 %v5203_v17 }
 0x3f4   : > { %4881 = vmatprep.subr.bf16.mxu1 %v5684_v22 }
 0x488   : > { %v1733_v19 = vpop.f32.mrb[28].mxu1 }
 0x489   : > { %v1734_v20 = vadd.f32 %v1733_v19, %v1633_v18  ;;  %v4793_v21 = vpop.f32.mrb[29].mxu1 }
 0x48a   : > { %v1736_v24 = vpop.f32.mrb[30].mxu1 }
 0x48b   : > { %v1737_v25 = vadd.f32 %v1736_v24, %v1638_v23  ;;  %v4794_v26 = vpop.f32.mrb[31].mxu1  ;;  %v1740_v27 = vmax.f32 %v1734_v20, 0.0 }
 0x48d   : > { %v1741_v28 = vmax.f32 %v1737_v25, 0.0 }
 0x48f   : > { %v1742_v29 = vpack.c.bf16 %v1741_v28, %v1740_v27 }
 0x491   : > { %1850 = vrot.lane.b32.xlu0 %v1742_v29, %s5686_s19 }
 0x4a0   : > { %v1680_v30 = vpop.f32.mrb[16].mxu0 }
 0x4a1   : > { %v1681_v31 = vadd.f32 %v1680_v30, %v1633_v18  ;;  %v4773_v32 = vpop.f32.mrb[17].mxu0  ;;  %v5205_v30 = vld [vmem:[#allocation10 + $0x80] sm:$0xff]  }
 0x4a2   : > { %v1683_v33 = vpop.f32.mrb[18].mxu0 }
 0x4a3   : > { %v1684_v34 = vadd.f32 %v1683_v33, %v1638_v23  ;;  %v4774_v35 = vpop.f32.mrb[19].mxu0  ;;  %v1687_v36 = vmax.f32 %v1681_v31, 0.0  ;;  %v5206_v31 = vld [vmem:[#allocation10 + $0xc0] sm:$0xff]   ;;  %v5207_v33 = vld [vmem:[#allocation10 + $0x88] sm:$0xff]  }
 0x4a4   : > { %v5209_v35 = vld [vmem:[#allocation10 + $0x90] sm:$0xff]  }
 0x4a5   : > { %v1688_v37 = vmax.f32 %v1684_v34, 0.0  ;;  %v5208_v34 = vld [vmem:[#allocation10 + $0xc8] sm:$0xff]  }
 0x4a7   : > { %v1689_v38 = vpack.c.bf16 %v1688_v37, %v1687_v36  ;;  %v5210_v36 = vld [vmem:[#allocation10 + $0xd0] sm:$0xff]   ;;  %v5211_v37 = vld [vmem:[#allocation10 + $0x98] sm:$0xff]  }
 0x4a8   : > { %v1839_v39 = vpop.f32.mrb[32].mxu1 }
 0x4a9   : > { %v1840_v40 = vadd.f32 %v1839_v39, %v1633_v18  ;;  %v4833_v41 = vpop.f32.mrb[33].mxu1  ;;  %v5213_v39 = vld [vmem:[#allocation10 + $0xa0] sm:$0xff]  }
 0x4aa   : > { %v1842_v42 = vpop.f32.mrb[34].mxu1  ;;  %v5215_v41 = vld [vmem:[#allocation10 + $0xa8] sm:$0xff]  }
 0x4ab   : > { %v1843_v43 = vadd.f32 %v1842_v42, %v1638_v23  ;;  %v4834_v44 = vpop.f32.mrb[35].mxu1  ;;  %v1846_v45 = vmax.f32 %v1840_v40, 0.0  ;;  %v5214_v40 = vld [vmem:[#allocation10 + $0xe0] sm:$0xff]   ;;  %v5216_v42 = vld [vmem:[#allocation10 + $0xe8] sm:$0xff]  }
 0x4ac   : > { %v5218_v44 = vld [vmem:[#allocation10 + $0xf0] sm:$0xff]  }
 0x4ad   : > { %v1847_v46 = vmax.f32 %v1843_v43, 0.0  ;;  %v5217_v43 = vld [vmem:[#allocation10 + $0xb0] sm:$0xff]  }
 0x4af   : > { %v1848_v47 = vpack.c.bf16 %v1847_v46, %v1846_v45  ;;  %v5219_v45 = vld [vmem:[#allocation10 + $0xb8] sm:$0xff]  }
 0x4b0   : > { %v5220_v46 = vld [vmem:[#allocation10 + $0xf8] sm:$0xff]  }
 0x4b1   : > { %1856 = vrot.lane.b32.xlu0 %v1848_v47, %s5687_s29  ;;  %v5221_v47 = vld [vmem:[#allocation10 + $0x140] sm:$0xff]  }
 0x4b5   : > { %1879 = vperm.xlu0 %5142, %v1871_v48   ;;  %v5222_v48 = vld [vmem:[#allocation10 + $0x180] sm:$0xff]  }
 0x4c0   : > { %v1786_v49 = vpop.f32.mrb[20].mxu0 }
 0x4c1   : > { %v1787_v50 = vadd.f32 %v1786_v49, %v1633_v18  ;;  %v4813_v51 = vpop.f32.mrb[21].mxu0  ;;  %v5204_v18 = vld [vmem:[#allocation10 + $0x78] sm:$0xff]   ;;  %v5223_v49 = vld [vmem:[#allocation10 + $0x148] sm:$0xff]  }
 0x4c2   : > { %v1789_v52 = vpop.f32.mrb[22].mxu0  ;;  %v5225_v51 = vld [vmem:[#allocation10 + $0x150] sm:$0xff]  }
 0x4c3   : > { %v1790_v53 = vadd.f32 %v1789_v52, %v1638_v23  ;;  %v4814_v54 = vpop.f32.mrb[23].mxu0  ;;  %v1793_v55 = vmax.f32 %v1787_v50, 0.0  ;;  %v5224_v50 = vld [vmem:[#allocation10 + $0x188] sm:$0xff]   ;;  %v5226_v52 = vld [vmem:[#allocation10 + $0x190] sm:$0xff]  }
 0x4c4   : > { %v5228_v54 = vld [vmem:[#allocation10 + $0x198] sm:$0xff]  }
 0x4c5   : > { %v1794_v56 = vmax.f32 %v1790_v53, 0.0  ;;  %v5227_v53 = vld [vmem:[#allocation10 + $0x158] sm:$0xff]  }
 0x4c7   : > { %v1795_v57 = vpack.c.bf16 %v1794_v56, %v1793_v55  ;;  %v5229_v55 = vld [vmem:[#allocation10 + $0x160] sm:$0xff]  }
 0x4c8   : > { %v5230_v56 = vld [vmem:[#allocation10 + $0x1a0] sm:$0xff]  }
 0x4c9   : > { %1853 = vrot.lane.b32.xlu1 %v1795_v57, %s5688_s16  ;;  %v5231_v57 = vld [vmem:[#allocation10 + $0x168] sm:$0xff]  }
 0x4cd   : > { %1874 = vperm.xlu1 %5143, %v1870_v58   ;;  %v5232_v58 = vld [vmem:[#allocation10 + $0x1a8] sm:$0xff]  }
 0x4d1   : > { %2794 = vperm.xlu1 %5143, %v2791_v59   ;;  %v5233_v59 = vld [vmem:[#allocation10 + $0x170] sm:$0xff]  }
 0x503   : > { %v1851_v2 = vpop.permute.xlu0 %1850 }
 0x504   : > { %v1860_v3 = vsel %vm1015_vm0, %v1689_v38, %v1851_v2  ;;  %v5212_v38 = vld [vmem:[#allocation10 + $0xd8] sm:$0xff]   ;;  %v5240_v2 = vld [vmem:[#allocation10 + $0x208] sm:$0xff]  }
 0x523   : > { %v1857_v5 = vpop.permute.xlu0 %1856 }
 0x534   : > { %v1880_v24 = vpop.permute.xlu0 %1879 }
 0x53b   : > { %v1854_v4 = vpop.permute.xlu1 %1853 }
 0x53c   : > { %v1863_v6 = vsel %vm1861_vm2, %v1860_v3, %v1854_v4  ;;  %v5241_v3 = vld [vmem:[#allocation10 + $0x1d0] sm:$0xff]  }
 0x53d   : > { %v1866_v7 = vsel %vm1864_vm3, %v1863_v6, %v1857_v5  ;;  %v5242_v4 = vld [vmem:[#allocation10 + $0x210] sm:$0xff]   ;;  %v5243_v5 = vld [vmem:[#allocation10 + $0x1d8] sm:$0xff]  }
 0x53e   : > { %4836 = vmatpush3.bf16.msra.mxu0 %v1866_v7  ;;  %v5244_v6 = vld [vmem:[#allocation10 + $0x218] sm:$0xff]   ;;  %v5245_v7 = vld [vmem:[#allocation10 + $0x1e0] sm:$0xff]  }
 0x53f   : > { %4861 = vmatprep.subr.bf16.mxu0 %v5684_v22 }
 0x541   : > { %4838 = vmatmul.mubr.msk.bf16.vlgmr.msra.gmra.mrb[24].mxu0 %vm1887_vm4, %v5188_v8  ;;  %v5246_v8 = vld [vmem:[#allocation10 + $0x220] sm:$0xff]  }
 0x542   : > { %4862 = vmatpush3.bf16.msra.mxu0 %v5190_v9  ;;  %4877 = vmatprep.mubr.msk.bf16.mxu0 %vm5685_vm1, %v5684_v22  ;;  %v5247_v9 = vld [vmem:[#allocation10 + $0x1e8] sm:$0xff]  }
 0x543   : > { %4863 = vmatprep.subr.bf16.mxu0 %v5684_v22 }
 0x546   : > { %4864 = vmatpush3.bf16.msra.mxu0 %v5192_v10  ;;  %v5248_v10 = vld [vmem:[#allocation10 + $0x228] sm:$0xff]  }
 0x547   : > { %4865 = vmatprep.subr.bf16.mxu0 %v5684_v22 }
 0x54a   : > { %4866 = vmatpush3.bf16.msra.mxu0 %v5194_v11  ;;  %v5249_v11 = vld [vmem:[#allocation10 + $0x1f0] sm:$0xff]  }
 0x54b   : > { %4867 = vmatprep.subr.bf16.mxu0 %v5684_v22 }
 0x54c   : > { %v1875_v19 = vpop.permute.xlu1 %1874 }
 0x54e   : > { %4868 = vmatpush3.bf16.msra.mxu0 %v5196_v12  ;;  %v5250_v12 = vld [vmem:[#allocation10 + $0x230] sm:$0xff]  }
 0x54f   : > { %4869 = vmatprep.subr.bf16.mxu0 %v5684_v22 }
 0x552   : > { %4870 = vmatpush3.bf16.msra.mxu0 %v5198_v13  ;;  %v5251_v13 = vld [vmem:[#allocation10 + $0x1f8] sm:$0xff]  }
 0x553   : > { %4871 = vmatprep.subr.bf16.mxu0 %v5684_v22 }
 0x556   : > { %4872 = vmatpush3.bf16.msra.mxu0 %v5200_v14  ;;  %v5252_v14 = vld [vmem:[#allocation10 + $0x238] sm:$0xff]  }
 0x557   : > { %4873 = vmatprep.subr.bf16.mxu0 %v5684_v22 }
 0x55a   : > { %4874 = vmatpush3.bf16.msra.mxu0 %v5202_v16 }
 0x55b   : > { %4875 = vmatprep.subr.bf16.mxu0 %v5684_v22 }
 0x55e   : > { %4876 = vmatpush3.bf16.msra.mxu0 %v5204_v18 }
 0x55f   : > { %4901 = vmatprep.subr.bf16.mxu0 %v5684_v22 }
 0x614   : > { %v1925_v20 = vpop.f32.mrb[24].mxu0 }
 0x615   : > { %v1926_v21 = vadd.f32 %v1925_v20, %v1875_v19  ;;  %v4839_v23 = vpop.f32.mrb[25].mxu0 }
 0x616   : > { %v1928_v25 = vpop.f32.mrb[26].mxu0 }
 0x617   : > { %v1929_v26 = vadd.f32 %v1928_v25, %v1880_v24  ;;  %v4840_v27 = vpop.f32.mrb[27].mxu0  ;;  %v1932_v28 = vmax.f32 %v1926_v21, 0.0 }
 0x619   : > { %v1933_v29 = vmax.f32 %v1929_v26, 0.0 }
 0x61b   : > { %v6318_v32 = vpack.c.bf16 %v1933_v29, %v1932_v28 }
 0x61d   : > { %4858 = vmatmul.mubr.bf16.vlgmr.msra.gmra.mrb[36].mxu1 %v6318_v32  ;;  %4878 = vmatmul.mubr.bf16.vlgmr.msra.gmra.mrb[28].mxu0 %v6318_v32 }
 0x61e   : > { %4882 = vmatpush3.bf16.msra.mxu1 %v5205_v30  ;;  %4902 = vmatpush3.bf16.msra.mxu0 %v5206_v31 }
 0x61f   : > { %4883 = vmatprep.subr.bf16.mxu1 %v5684_v22  ;;  %4903 = vmatprep.subr.bf16.mxu0 %v5684_v22 }
 0x620   : > { %4897 = vmatprep.mubr.msk.bf16.mxu1 %vm5685_vm1, %v5684_v22  ;;  %4917 = vmatprep.mubr.msk.bf16.mxu0 %vm5685_vm1, %v5684_v22 }
 0x622   : > { %4884 = vmatpush3.bf16.msra.mxu1 %v5207_v33  ;;  %4904 = vmatpush3.bf16.msra.mxu0 %v5208_v34 }
 0x623   : > { %4885 = vmatprep.subr.bf16.mxu1 %v5684_v22  ;;  %4905 = vmatprep.subr.bf16.mxu0 %v5684_v22 }
 0x626   : > { %4886 = vmatpush3.bf16.msra.mxu1 %v5209_v35  ;;  %4906 = vmatpush3.bf16.msra.mxu0 %v5210_v36 }
 0x627   : > { %4887 = vmatprep.subr.bf16.mxu1 %v5684_v22  ;;  %4907 = vmatprep.subr.bf16.mxu0 %v5684_v22 }
 0x62a   : > { %4888 = vmatpush3.bf16.msra.mxu1 %v5211_v37  ;;  %4908 = vmatpush3.bf16.msra.mxu0 %v5212_v38  ;;  %v2790_v37 = vld [vmem:[%s6070_s8] sm:$0xf] }
 0x62b   : > { %4889 = vmatprep.subr.bf16.mxu1 %v5684_v22  ;;  %4909 = vmatprep.subr.bf16.mxu0 %v5684_v22 }
 0x62e   : > { %4890 = vmatpush3.bf16.msra.mxu1 %v5213_v39  ;;  %4910 = vmatpush3.bf16.msra.mxu0 %v5214_v40 }
 0x62f   : > { %4891 = vmatprep.subr.bf16.mxu1 %v5684_v22  ;;  %4911 = vmatprep.subr.bf16.mxu0 %v5684_v22 }
 0x632   : > { %4892 = vmatpush3.bf16.msra.mxu1 %v5215_v41  ;;  %4912 = vmatpush3.bf16.msra.mxu0 %v5216_v42 }
 0x633   : > { %4893 = vmatprep.subr.bf16.mxu1 %v5684_v22  ;;  %4913 = vmatprep.subr.bf16.mxu0 %v5684_v22 }
 0x636   : > { %4894 = vmatpush3.bf16.msra.mxu1 %v5217_v43  ;;  %4914 = vmatpush3.bf16.msra.mxu0 %v5218_v44 }
 0x637   : > { %4895 = vmatprep.subr.bf16.mxu1 %v5684_v22  ;;  %4915 = vmatprep.subr.bf16.mxu0 %v5684_v22 }
 0x63a   : > { %4896 = vmatpush3.bf16.msra.mxu1 %v5219_v45  ;;  %4916 = vmatpush3.bf16.msra.mxu0 %v5220_v46 }
 0x63b   : > { %4921 = vmatprep.subr.bf16.mxu1 %v5684_v22  ;;  %4941 = vmatprep.subr.bf16.mxu0 %v5684_v22 }
 0x63d   : > { %4898 = vmatmul.mubr.bf16.vlgmr.msra.gmra.mrb[40].mxu1 %v6318_v32  ;;  %4918 = vmatmul.mubr.bf16.vlgmr.msra.gmra.mrb[32].mxu0 %v6318_v32 }
 0x63e   : > { %4922 = vmatpush3.bf16.msra.mxu1 %v5221_v47  ;;  %4942 = vmatpush3.bf16.msra.mxu0 %v5222_v48  ;;  %v4340_v48 = vld [vmem:[%s6070_s8 + $0x4] sm:$0xf] }
 0x63f   : > { %4923 = vmatprep.subr.bf16.mxu1 %v5684_v22  ;;  %4943 = vmatprep.subr.bf16.mxu0 %v5684_v22 }
 0x640   : > { %4937 = vmatprep.mubr.msk.bf16.mxu1 %vm5685_vm1, %v5684_v22  ;;  %4957 = vmatprep.mubr.msk.bf16.mxu0 %vm5685_vm1, %v5684_v22 }
 0x642   : > { %4924 = vmatpush3.bf16.msra.mxu1 %v5223_v49  ;;  %4944 = vmatpush3.bf16.msra.mxu0 %v5224_v50 }
 0x643   : > { %4925 = vmatprep.subr.bf16.mxu1 %v5684_v22  ;;  %4945 = vmatprep.subr.bf16.mxu0 %v5684_v22 }
 0x646   : > { %4926 = vmatpush3.bf16.msra.mxu1 %v5225_v51  ;;  %4946 = vmatpush3.bf16.msra.mxu0 %v5226_v52 }
 0x647   : > { %4927 = vmatprep.subr.bf16.mxu1 %v5684_v22  ;;  %4947 = vmatprep.subr.bf16.mxu0 %v5684_v22 }
 0x64a   : > { %4928 = vmatpush3.bf16.msra.mxu1 %v5227_v53  ;;  %4948 = vmatpush3.bf16.msra.mxu0 %v5228_v54 }
 0x64b   : > { %4929 = vmatprep.subr.bf16.mxu1 %v5684_v22  ;;  %4949 = vmatprep.subr.bf16.mxu0 %v5684_v22 }
 0x64e   : > { %4930 = vmatpush3.bf16.msra.mxu1 %v5229_v55  ;;  %4950 = vmatpush3.bf16.msra.mxu0 %v5230_v56 }
 0x64f   : > { %4931 = vmatprep.subr.bf16.mxu1 %v5684_v22  ;;  %4951 = vmatprep.subr.bf16.mxu0 %v5684_v22 }
 0x652   : > { %4932 = vmatpush3.bf16.msra.mxu1 %v5231_v57  ;;  %4952 = vmatpush3.bf16.msra.mxu0 %v5232_v58  ;;  %v5255_v58 = vld [vmem:[%s6909_s20 + $0x4] ss:$16 sps:$4 sm:$0xff]  }
 0x653   : > { %4933 = vmatprep.subr.bf16.mxu1 %v5684_v22  ;;  %4953 = vmatprep.subr.bf16.mxu0 %v5684_v22 }
 0x656   : > { %4934 = vmatpush3.bf16.msra.mxu1 %v5233_v59  ;;  %4954 = vmatpush3.bf16.msra.mxu0 %v5234_v60  ;;  %v5258_v59 = vld [vmem:[%s6909_s20 + $0xc] ss:$16 sps:$4 sm:$0xff]   ;;  %v4342_v60 = vld [vmem:[%s6070_s8 + $0x8] sm:$0xf] }
 0x657   : > { %4935 = vmatprep.subr.bf16.mxu1 %v5684_v22  ;;  %4955 = vmatprep.subr.bf16.mxu0 %v5684_v22 }
 0x65a   : > { %4936 = vmatpush3.bf16.msra.mxu1 %v5235_v61  ;;  %4956 = vmatpush3.bf16.msra.mxu0 %v5236_v62  ;;  %v4344_v61 = vld [vmem:[%s6070_s8 + $0xc] sm:$0xf]  ;;  %v5253_v62 = vld [vmem:[%s6909_s20] ss:$16 sps:$4 sm:$0xff]  }
 0x65b   : > { %4961 = vmatprep.subr.bf16.mxu1 %v5684_v22  ;;  %4981 = vmatprep.subr.bf16.mxu0 %v5684_v22 }
 0x65d   : > { %4938 = vmatmul.mubr.bf16.vlgmr.msra.gmra.mrb[44].mxu1 %v6318_v32  ;;  %4958 = vmatmul.mubr.bf16.vlgmr.msra.gmra.mrb[36].mxu0 %v6318_v32 }
 0x65e   : > { %4962 = vmatpush3.bf16.msra.mxu1 %v5237_v63  ;;  %4982 = vmatpush3.bf16.msra.mxu0 %v5238_v0  ;;  %v5261_v63 = vld [vmem:[%s6909_s20 + $0x24] ss:$16 sps:$4 sm:$0xff]   ;;  %v5264_v0 = vld [vmem:[%s6909_s20 + $0x2c] ss:$16 sps:$4 sm:$0xff]  }
 0x65f   : > { %4963 = vmatprep.subr.bf16.mxu1 %v5684_v22  ;;  %4983 = vmatprep.subr.bf16.mxu0 %v5684_v22 }
 0x660   : > { %4977 = vmatprep.mubr.msk.bf16.mxu1 %vm5685_vm1, %v5684_v22  ;;  %4997 = vmatprep.mubr.msk.bf16.mxu0 %vm5685_vm1, %v5684_v22 }
 0x662   : > { %4964 = vmatpush3.bf16.msra.mxu1 %v5239_v1  ;;  %4984 = vmatpush3.bf16.msra.mxu0 %v5240_v2  ;;  %v5259_v1 = vld [vmem:[%s6909_s20 + $0x20] ss:$16 sps:$4 sm:$0xff]   ;;  %v5262_v2 = vld [vmem:[%s6909_s20 + $0x28] ss:$16 sps:$4 sm:$0xff]  }
 0x663   : > { %4965 = vmatprep.subr.bf16.mxu1 %v5684_v22  ;;  %4985 = vmatprep.subr.bf16.mxu0 %v5684_v22 }
 0x666   : > { %4966 = vmatpush3.bf16.msra.mxu1 %v5241_v3  ;;  %4986 = vmatpush3.bf16.msra.mxu0 %v5242_v4  ;;  %v5267_v3 = vld [vmem:[%s6909_s20 + $0x44] ss:$16 sps:$4 sm:$0xff]   ;;  %v5270_v4 = vld [vmem:[%s6909_s20 + $0x4c] ss:$16 sps:$4 sm:$0xff]  }
 0x667   : > { %4967 = vmatprep.subr.bf16.mxu1 %v5684_v22  ;;  %4987 = vmatprep.subr.bf16.mxu0 %v5684_v22 }
 0x66a   : > { %4968 = vmatpush3.bf16.msra.mxu1 %v5243_v5  ;;  %4988 = vmatpush3.bf16.msra.mxu0 %v5244_v6  ;;  %v5265_v5 = vld [vmem:[%s6909_s20 + $0x40] ss:$16 sps:$4 sm:$0xff]   ;;  %v5268_v6 = vld [vmem:[%s6909_s20 + $0x48] ss:$16 sps:$4 sm:$0xff]  }
 0x66b   : > { %4969 = vmatprep.subr.bf16.mxu1 %v5684_v22  ;;  %4989 = vmatprep.subr.bf16.mxu0 %v5684_v22 }
 0x66e   : > { %4970 = vmatpush3.bf16.msra.mxu1 %v5245_v7  ;;  %4990 = vmatpush3.bf16.msra.mxu0 %v5246_v8  ;;  %v5273_v7 = vld [vmem:[%s6909_s20 + $0x64] ss:$16 sps:$4 sm:$0xff]   ;;  %v5276_v8 = vld [vmem:[%s6909_s20 + $0x6c] ss:$16 sps:$4 sm:$0xff]  }
 0x66f   : > { %4971 = vmatprep.subr.bf16.mxu1 %v5684_v22  ;;  %4991 = vmatprep.subr.bf16.mxu0 %v5684_v22 }
 0x672   : > { %4972 = vmatpush3.bf16.msra.mxu1 %v5247_v9  ;;  %4992 = vmatpush3.bf16.msra.mxu0 %v5248_v10  ;;  %v5271_v9 = vld [vmem:[%s6909_s20 + $0x60] ss:$16 sps:$4 sm:$0xff]   ;;  %v5274_v10 = vld [vmem:[%s6909_s20 + $0x68] ss:$16 sps:$4 sm:$0xff]  }
 0x673   : > { %4973 = vmatprep.subr.bf16.mxu1 %v5684_v22  ;;  %4993 = vmatprep.subr.bf16.mxu0 %v5684_v22 }
 0x676   : > { %4974 = vmatpush3.bf16.msra.mxu1 %v5249_v11  ;;  %4994 = vmatpush3.bf16.msra.mxu0 %v5250_v12  ;;  %v5279_v11 = vld [vmem:[%s6909_s20 + $0x84] ss:$16 sps:$4 sm:$0xff]   ;;  %v5282_v12 = vld [vmem:[%s6909_s20 + $0x8c] ss:$16 sps:$4 sm:$0xff]  }
 0x677   : > { %4975 = vmatprep.subr.bf16.mxu1 %v5684_v22  ;;  %4995 = vmatprep.subr.bf16.mxu0 %v5684_v22 }
 0x67a   : > { %4976 = vmatpush3.bf16.msra.mxu1 %v5251_v13  ;;  %4996 = vmatpush3.bf16.msra.mxu0 %v5252_v14  ;;  %v5277_v13 = vld [vmem:[%s6909_s20 + $0x80] ss:$16 sps:$4 sm:$0xff]   ;;  %v5280_v14 = vld [vmem:[%s6909_s20 + $0x88] ss:$16 sps:$4 sm:$0xff]  }
 0x67b   : > { %5001 = vmatprep.subr.bf16.mxu1 %v5684_v22  ;;  %5013 = vmatprep.subr.bf16.mxu0 %v5684_v22 }
 0x67d   : > { %4978 = vmatmul.mubr.bf16.vlgmr.msra.gmra.mrb[48].mxu1 %v6318_v32  ;;  %4998 = vmatmul.mubr.bf16.vlgmr.msra.gmra.mrb[40].mxu0 %v6318_v32 }
 0x67e   : > { %5002 = vmatpush3.bf16.msra.mxu1 %v6318_v32  ;;  %5014 = vmatpush3.bf16.msra.mxu0 %v6318_v32 }
 0x67f   : > { %5003 = vmatprep.subr.bf16.mxu1 %v5684_v22  ;;  %5009 = vmatprep.mubr.msk.bf16.mxu1 %vm5685_vm1, %v5684_v22 }
 0x680   : > { %5015 = vmatprep.subr.bf16.mxu0 %v5684_v22  ;;  %5021 = vmatprep.mubr.msk.bf16.mxu0 %vm5685_vm1, %v5684_v22 }
 0x6f0   : > { %v2033_v15 = vpop.f32.mrb[36].mxu1  ;;  %v2140_v16 = vpop.f32.mrb[28].mxu0 }
 0x6f1   : > { %v4859_v17 = vpop.f32.mrb[37].mxu1  ;;  %v4879_v18 = vpop.f32.mrb[29].mxu0 }
 0x6f2   : > { %v2036_v19 = vpop.f32.mrb[38].mxu1  ;;  %v2143_v20 = vpop.f32.mrb[30].mxu0  ;;  %v5283_v17 = vld [vmem:[%s6909_s20 + $0xa0] ss:$16 sps:$4 sm:$0xff]   ;;  %v5286_v18 = vld [vmem:[%s6909_s20 + $0xa8] ss:$16 sps:$4 sm:$0xff]  }
 0x6f3   : > { %v2040_v21 = vpack.c.bf16 %v2036_v19, %v2033_v15  ;;  %v2147_v23 = vpack.c.bf16 %v2143_v20, %v2140_v16  ;;  %v4860_v24 = vpop.f32.mrb[39].mxu1  ;;  %v4880_v25 = vpop.f32.mrb[31].mxu0  ;;  %v5285_v15 = vld [vmem:[%s6909_s20 + $0xa4] ss:$16 sps:$4 sm:$0xff]   ;;  %v5288_v16 = vld [vmem:[%s6909_s20 + $0xac] ss:$16 sps:$4 sm:$0xff]  }
 0x6f4   : > { %v5291_v19 = vld [vmem:[%s6909_s20 + $0xc4] ss:$16 sps:$4 sm:$0xff]   ;;  %v5294_v20 = vld [vmem:[%s6909_s20 + $0xcc] ss:$16 sps:$4 sm:$0xff]  }
 0x6f5   : > { %v5297_v24 = vld [vmem:[%s6909_s20 + $0xe4] ss:$16 sps:$4 sm:$0xff]   ;;  %v5300_v25 = vld [vmem:[%s6909_s20 + $0xec] ss:$16 sps:$4 sm:$0xff]  }
 0x710   : > { %v2247_v26 = vpop.f32.mrb[40].mxu1  ;;  %v2354_v27 = vpop.f32.mrb[32].mxu0 }
 0x711   : > { %v4899_v28 = vpop.f32.mrb[41].mxu1  ;;  %v4919_v29 = vpop.f32.mrb[33].mxu0 }
 0x712   : > { %v2250_v30 = vpop.f32.mrb[42].mxu1  ;;  %v2357_v31 = vpop.f32.mrb[34].mxu0  ;;  %v5303_v28 = vld [vmem:[%s6909_s20 + $0x104] ss:$16 sps:$4 sm:$0xff]   ;;  %v5301_v29 = vld [vmem:[%s6909_s20 + $0x100] ss:$16 sps:$4 sm:$0xff]  }
 0x713   : > { %v2254_v33 = vpack.c.bf16 %v2250_v30, %v2247_v26  ;;  %v2361_v34 = vpack.c.bf16 %v2357_v31, %v2354_v27  ;;  %v4900_v35 = vpop.f32.mrb[43].mxu1  ;;  %v4920_v36 = vpop.f32.mrb[35].mxu0  ;;  %v5295_v26 = vld [vmem:[%s6909_s20 + $0xe0] ss:$16 sps:$4 sm:$0xff]   ;;  %v5298_v27 = vld [vmem:[%s6909_s20 + $0xe8] ss:$16 sps:$4 sm:$0xff]  }
 0x714   : > { %v5304_v30 = vld [vmem:[%s6909_s20 + $0x108] ss:$16 sps:$4 sm:$0xff]   ;;  %v5306_v31 = vld [vmem:[%s6909_s20 + $0x10c] ss:$16 sps:$4 sm:$0xff]   ;;  %v5307_v35 = vld [vmem:[%s6909_s20 + $0x120] ss:$16 sps:$4 sm:$0xff]  }
 0x715   : > { %5004 = vmatpush3.bf16.msra.mxu1 %v2361_v34  ;;  %v5310_v36 = vld [vmem:[%s6909_s20 + $0x128] ss:$16 sps:$4 sm:$0xff]  }
 0x716   : > { %5005 = vmatprep.subr.bf16.mxu1 %v5684_v22 }
 0x719   : > { %5006 = vmatpush3.bf16.msra.mxu1 %v2147_v23 }
 0x71a   : > { %5007 = vmatprep.subr.bf16.mxu1 %v5684_v22 }
 0x71d   : > { %5008 = vmatpush3.bf16.msra.mxu1 %v2040_v21  ;;  %v5289_v21 = vld [vmem:[%s6909_s20 + $0xc0] ss:$16 sps:$4 sm:$0xff]  }
 0x71e   : > { %5025 = vmatprep.subr.bf16.mxu1 %v5684_v22 }
 0x720   : > { %5010 = vmatmul.mubr.msk.bf16.vlgmr.msra.gmra.mrb[52].mxu1 %vm1861_vm2, %v2790_v37  ;;  %v5315_v37 = vld [vmem:[%s6909_s20 + $0x144] ss:$16 sps:$4 sm:$0xff]  }
 0x721   : > { %5026 = vmatpush3.bf16.msra.mxu1 %v6318_v32  ;;  %5033 = vmatprep.mubr.msk.bf16.mxu1 %vm5685_vm1, %v5684_v22 }
 0x722   : > { %5027 = vmatprep.subr.bf16.mxu1 %v5684_v22 }
 0x725   : > { %5028 = vmatpush3.bf16.msra.mxu1 %v2361_v34  ;;  %v5312_v34 = vld [vmem:[%s6909_s20 + $0x12c] ss:$16 sps:$4 sm:$0xff]  }
 0x726   : > { %5029 = vmatprep.subr.bf16.mxu1 %v5684_v22 }
 0x730   : > { %v2461_v38 = vpop.f32.mrb[44].mxu1  ;;  %v2568_v39 = vpop.f32.mrb[36].mxu0 }
 0x731   : > { %v4939_v40 = vpop.f32.mrb[45].mxu1  ;;  %v4959_v41 = vpop.f32.mrb[37].mxu0 }
 0x732   : > { %v2464_v42 = vpop.f32.mrb[46].mxu1  ;;  %v2571_v43 = vpop.f32.mrb[38].mxu0  ;;  %v5316_v40 = vld [vmem:[%s6909_s20 + $0x148] ss:$16 sps:$4 sm:$0xff]   ;;  %v5321_v41 = vld [vmem:[%s6909_s20 + $0x164] ss:$16 sps:$4 sm:$0xff]  }
 0x733   : > { %v2468_v44 = vpack.c.bf16 %v2464_v42, %v2461_v38  ;;  %v2575_v45 = vpack.c.bf16 %v2571_v43, %v2568_v39  ;;  %v4940_v46 = vpop.f32.mrb[47].mxu1  ;;  %v4960_v47 = vpop.f32.mrb[39].mxu0  ;;  %v5318_v38 = vld [vmem:[%s6909_s20 + $0x14c] ss:$16 sps:$4 sm:$0xff]   ;;  %v5313_v39 = vld [vmem:[%s6909_s20 + $0x140] ss:$16 sps:$4 sm:$0xff]  }
 0x734   : > { %v5324_v42 = vld [vmem:[%s6909_s20 + $0x16c] ss:$16 sps:$4 sm:$0xff]   ;;  %v5319_v43 = vld [vmem:[%s6909_s20 + $0x160] ss:$16 sps:$4 sm:$0xff]  }
 0x735   : > { %5016 = vmatpush3.bf16.msra.mxu0 %v2468_v44  ;;  %v5330_v46 = vld [vmem:[%s6909_s20 + $0x18c] ss:$16 sps:$4 sm:$0xff]   ;;  %v5325_v47 = vld [vmem:[%s6909_s20 + $0x180] ss:$16 sps:$4 sm:$0xff]  }
 0x736   : > { %5017 = vmatprep.subr.bf16.mxu0 %v5684_v22 }
 0x739   : > { %5018 = vmatpush3.bf16.msra.mxu0 %v2147_v23  ;;  %v5292_v23 = vld [vmem:[%s6909_s20 + $0xc8] ss:$16 sps:$4 sm:$0xff]  }
 0x73a   : > { %5019 = vmatprep.subr.bf16.mxu0 %v5684_v22 }
 0x73d   : > { %5020 = vmatpush3.bf16.msra.mxu0 %v2254_v33  ;;  %v5309_v33 = vld [vmem:[%s6909_s20 + $0x124] ss:$16 sps:$4 sm:$0xff]  }
 0x73e   : > { %5037 = vmatprep.subr.bf16.mxu0 %v5684_v22 }
 0x740   : > { %5022 = vmatmul.mubr.msk.bf16.vlgmr.msra.gmra.mrb[44].mxu0 %vm1861_vm2, %v4340_v48  ;;  %v5328_v48 = vld [vmem:[%s6909_s20 + $0x188] ss:$16 sps:$4 sm:$0xff]  }
 0x741   : > { %5038 = vmatpush3.bf16.msra.mxu0 %v6318_v32  ;;  %5045 = vmatprep.mubr.msk.bf16.mxu0 %vm5685_vm1, %v5684_v22 }
 0x742   : > { %5039 = vmatprep.subr.bf16.mxu0 %v5684_v22 }
 0x745   : > { %5040 = vmatpush3.bf16.msra.mxu0 %v2468_v44  ;;  %v5322_v44 = vld [vmem:[%s6909_s20 + $0x168] ss:$16 sps:$4 sm:$0xff]  }
 0x746   : > { %5041 = vmatprep.subr.bf16.mxu0 %v5684_v22 }
 0x750   : > { %v2675_v49 = vpop.f32.mrb[48].mxu1  ;;  %v2782_v50 = vpop.f32.mrb[40].mxu0 }
 0x751   : > { %v4979_v51 = vpop.f32.mrb[49].mxu1  ;;  %v4999_v52 = vpop.f32.mrb[41].mxu0 }
 0x752   : > { %v2678_v53 = vpop.f32.mrb[50].mxu1  ;;  %v2785_v54 = vpop.f32.mrb[42].mxu0  ;;  %v5331_v51 = vld [vmem:[%s6909_s20 + $0x1a0] ss:$16 sps:$4 sm:$0xff]   ;;  %v5334_v52 = vld [vmem:[%s6909_s20 + $0x1a8] ss:$16 sps:$4 sm:$0xff]  }
 0x753   : > { %v2682_v55 = vpack.c.bf16 %v2678_v53, %v2675_v49  ;;  %v2789_v56 = vpack.c.bf16 %v2785_v54, %v2782_v50  ;;  %v4980_v57 = vpop.f32.mrb[51].mxu1  ;;  %v5000_v32 = vpop.f32.mrb[43].mxu0  ;;  %v5333_v49 = vld [vmem:[%s6909_s20 + $0x1a4] ss:$16 sps:$4 sm:$0xff]   ;;  %v5336_v50 = vld [vmem:[%s6909_s20 + $0x1ac] ss:$16 sps:$4 sm:$0xff]  }
 0x754   : > { %v5339_v53 = vld [vmem:[%s6909_s20 + $0x1c4] ss:$16 sps:$4 sm:$0xff]   ;;  %v5342_v54 = vld [vmem:[%s6909_s20 + $0x1cc] ss:$16 sps:$4 sm:$0xff]  }
 0x755   : > { %5030 = vmatpush3.bf16.msra.mxu1 %v2682_v55  ;;  %5042 = vmatpush3.bf16.msra.mxu0 %v2682_v55  ;;  %v5337_v55 = vld [vmem:[%s6909_s20 + $0x1c0] ss:$16 sps:$4 sm:$0xff]   ;;  %v5345_v57 = vld [vmem:[%s6909_s20 + $0x1e4] ss:$16 sps:$4 sm:$0xff]   ;;  %v5348_v32 = vld [vmem:[%s6909_s20 + $0x1ec] ss:$16 sps:$4 sm:$0xff]  }
 0x756   : > { %5031 = vmatprep.subr.bf16.mxu1 %v5684_v22  ;;  %5043 = vmatprep.subr.bf16.mxu0 %v5684_v22  ;;  %v5256_v22 = vld [vmem:[%s6909_s20 + $0x8] ss:$16 sps:$4 sm:$0xff]  }
 0x759   : > { %5032 = vmatpush3.bf16.msra.mxu1 %v2575_v45  ;;  %5044 = vmatpush3.bf16.msra.mxu0 %v2789_v56  ;;  %v5327_v45 = vld [vmem:[%s6909_s20 + $0x184] ss:$16 sps:$4 sm:$0xff]   ;;  %v5340_v56 = vld [vmem:[%s6909_s20 + $0x1c8] ss:$16 sps:$4 sm:$0xff]  }
 0x75a   : > { %3751 = vmatprep.subr.bf16.mxu1 %v5255_v58  ;;  %3833 = vmatprep.subr.bf16.mxu0 %v5258_v59  ;;  %v5343_v58 = vld [vmem:[%s6909_s20 + $0x1e0] ss:$16 sps:$4 sm:$0xff]   ;;  %v5346_v59 = vld [vmem:[%s6909_s20 + $0x1e8] ss:$16 sps:$4 sm:$0xff]  }
 0x75c   : > { %5034 = vmatmul.mubr.msk.bf16.vlgmr.msra.gmra.mrb[56].mxu1 %vm1861_vm2, %v4342_v60  ;;  %5046 = vmatmul.mubr.msk.bf16.vlgmr.msra.gmra.mrb[48].mxu0 %vm1861_vm2, %v4344_v61  ;;  %v5351_v60 = vld [vmem:[%s6909_s20 + $0x204] ss:$16 sps:$4 sm:$0xff]   ;;  %v5354_v61 = vld [vmem:[%s6909_s20 + $0x20c] ss:$16 sps:$4 sm:$0xff]  }
 0x75d   : > { %3752 = vmatpush1.bf16.msra.mxu1 %v5253_v62  ;;  %3834 = vmatpush1.bf16.msra.mxu0 %v5256_v22 }
 0x75e   : > { %3753 = vmatprep.subr.bf16.mxu1 %v5261_v63  ;;  %3835 = vmatprep.subr.bf16.mxu0 %v5264_v0 }
 0x761   : > { %3754 = vmatpush1.bf16.msra.mxu1 %v5259_v1  ;;  %3836 = vmatpush1.bf16.msra.mxu0 %v5262_v2  ;;  %v2795_v1 = vpop.permute.xlu1 %2794 }
 0x762   : > { %3755 = vmatprep.subr.bf16.mxu1 %v5267_v3  ;;  %3837 = vmatprep.subr.bf16.mxu0 %v5270_v4 }
 0x765   : > { %3756 = vmatpush1.bf16.msra.mxu1 %v5265_v5  ;;  %3838 = vmatpush1.bf16.msra.mxu0 %v5268_v6 }
 0x766   : > { %3757 = vmatprep.subr.bf16.mxu1 %v5273_v7  ;;  %3839 = vmatprep.subr.bf16.mxu0 %v5276_v8 }
 0x769   : > { %3758 = vmatpush1.bf16.msra.mxu1 %v5271_v9  ;;  %3840 = vmatpush1.bf16.msra.mxu0 %v5274_v10 }
 0x76a   : > { %3759 = vmatprep.subr.bf16.mxu1 %v5279_v11  ;;  %3841 = vmatprep.subr.bf16.mxu0 %v5282_v12  ;;  %v5349_v11 = vld [vmem:[%s6909_s20 + $0x200] ss:$16 sps:$4 sm:$0xff]   ;;  %v5352_v12 = vld [vmem:[%s6909_s20 + $0x208] ss:$16 sps:$4 sm:$0xff]  }
 0x76d   : > { %3760 = vmatpush1.bf16.msra.mxu1 %v5277_v13  ;;  %3842 = vmatpush1.bf16.msra.mxu0 %v5280_v14  ;;  %v5357_v14 = vld [vmem:[%s6909_s20 + $0x224] ss:$16 sps:$4 sm:$0xff]  }
 0x76e   : > { %3761 = vmatprep.subr.bf16.mxu1 %v5285_v15  ;;  %3843 = vmatprep.subr.bf16.mxu0 %v5288_v16  ;;  %v5360_v15 = vld [vmem:[%s6909_s20 + $0x22c] ss:$16 sps:$4 sm:$0xff]   ;;  %v5355_v16 = vld [vmem:[%s6909_s20 + $0x220] ss:$16 sps:$4 sm:$0xff]  }
 0x771   : > { %3762 = vmatpush1.bf16.msra.mxu1 %v5283_v17  ;;  %3844 = vmatpush1.bf16.msra.mxu0 %v5286_v18  ;;  %v5358_v17 = vld [vmem:[%s6909_s20 + $0x228] ss:$16 sps:$4 sm:$0xff]   ;;  %v5363_v18 = vld [vmem:[%s6909_s20 + $0x244] ss:$16 sps:$4 sm:$0xff]  }
 0x772   : > { %3763 = vmatprep.subr.bf16.mxu1 %v5291_v19  ;;  %3845 = vmatprep.subr.bf16.mxu0 %v5294_v20  ;;  %v5366_v19 = vld [vmem:[%s6909_s20 + $0x24c] ss:$16 sps:$4 sm:$0xff]   ;;  %v5361_v20 = vld [vmem:[%s6909_s20 + $0x240] ss:$16 sps:$4 sm:$0xff]  }
 0x775   : > { %3764 = vmatpush1.bf16.msra.mxu1 %v5289_v21  ;;  %3846 = vmatpush1.bf16.msra.mxu0 %v5292_v23  ;;  %v5364_v21 = vld [vmem:[%s6909_s20 + $0x248] ss:$16 sps:$4 sm:$0xff]   ;;  %v5369_v23 = vld [vmem:[%s6909_s20 + $0x264] ss:$16 sps:$4 sm:$0xff]  }
 0x776   : > { %3765 = vmatprep.subr.bf16.mxu1 %v5297_v24  ;;  %3847 = vmatprep.subr.bf16.mxu0 %v5300_v25  ;;  %v5372_v24 = vld [vmem:[%s6909_s20 + $0x26c] ss:$16 sps:$4 sm:$0xff]   ;;  %v5367_v25 = vld [vmem:[%s6909_s20 + $0x260] ss:$16 sps:$4 sm:$0xff]  }
 0x779   : > { %3766 = vmatpush1.bf16.msra.mxu1 %v5295_v26  ;;  %3848 = vmatpush1.bf16.msra.mxu0 %v5298_v27  ;;  %v5370_v26 = vld [vmem:[%s6909_s20 + $0x268] ss:$16 sps:$4 sm:$0xff]   ;;  %v5375_v27 = vld [vmem:[%s6909_s20 + $0x284] ss:$16 sps:$4 sm:$0xff]  }
 0x77a   : > { %3767 = vmatprep.subr.bf16.mxu1 %v5303_v28  ;;  %3849 = vmatprep.subr.bf16.mxu0 %v5306_v31  ;;  %v5378_v28 = vld [vmem:[%s6909_s20 + $0x28c] ss:$16 sps:$4 sm:$0xff]   ;;  %v5381_v31 = vld [vmem:[%s6909_s20 + $0x2a4] ss:$16 sps:$4 sm:$0xff]  }
 0x77d   : > { %3768 = vmatpush1.bf16.msra.mxu1 %v5301_v29  ;;  %3850 = vmatpush1.bf16.msra.mxu0 %v5304_v30  ;;  %v5373_v29 = vld [vmem:[%s6909_s20 + $0x280] ss:$16 sps:$4 sm:$0xff]   ;;  %v5376_v30 = vld [vmem:[%s6909_s20 + $0x288] ss:$16 sps:$4 sm:$0xff]  }
 0x77e   : > { %3769 = vmatprep.subr.bf16.mxu1 %v5309_v33  ;;  %3851 = vmatprep.subr.bf16.mxu0 %v5312_v34  ;;  %v5384_v33 = vld [vmem:[%s6909_s20 + $0x2ac] ss:$16 sps:$4 sm:$0xff]   ;;  %v5379_v34 = vld [vmem:[%s6909_s20 + $0x2a0] ss:$16 sps:$4 sm:$0xff]  }
 0x781   : > { %3770 = vmatpush1.bf16.msra.mxu1 %v5307_v35  ;;  %3852 = vmatpush1.bf16.msra.mxu0 %v5310_v36  ;;  %v5382_v35 = vld [vmem:[%s6909_s20 + $0x2a8] ss:$16 sps:$4 sm:$0xff]   ;;  %v5387_v36 = vld [vmem:[%s6909_s20 + $0x2c4] ss:$16 sps:$4 sm:$0xff]  }
 0x782   : > { %3771 = vmatprep.subr.bf16.mxu1 %v5315_v37  ;;  %3853 = vmatprep.subr.bf16.mxu0 %v5318_v38  ;;  %v5390_v37 = vld [vmem:[%s6909_s20 + $0x2cc] ss:$16 sps:$4 sm:$0xff]  }
 0x785   : > { %3772 = vmatpush1.bf16.msra.mxu1 %v5313_v39  ;;  %3854 = vmatpush1.bf16.msra.mxu0 %v5316_v40 }
 0x786   : > { %3773 = vmatprep.subr.bf16.mxu1 %v5321_v41  ;;  %3855 = vmatprep.subr.bf16.mxu0 %v5324_v42  ;;  %v5385_v42 = vld [vmem:[%s6909_s20 + $0x2c0] ss:$16 sps:$4 sm:$0xff]  }
 0x789   : > { %3774 = vmatpush1.bf16.msra.mxu1 %v5319_v43  ;;  %3856 = vmatpush1.bf16.msra.mxu0 %v5322_v44  ;;  %v5388_v43 = vld [vmem:[%s6909_s20 + $0x2c8] ss:$16 sps:$4 sm:$0xff]  }
 0x78a   : > { %3775 = vmatprep.subr.bf16.mxu1 %v5327_v45  ;;  %3857 = vmatprep.subr.bf16.mxu0 %v5330_v46  ;;  %v5393_v46 = vld [vmem:[%s6909_s20 + $0x2e4] ss:$16 sps:$4 sm:$0xff]  }
 0x78d   : > { %3776 = vmatpush1.bf16.msra.mxu1 %v5325_v47  ;;  %3858 = vmatpush1.bf16.msra.mxu0 %v5328_v48  ;;  %v5396_v47 = vld [vmem:[%s6909_s20 + $0x2ec] ss:$16 sps:$4 sm:$0xff]  }
 0x78e   : > { %3777 = vmatprep.subr.bf16.mxu1 %v5333_v49  ;;  %3859 = vmatprep.subr.bf16.mxu0 %v5336_v50 }
 0x791   : > { %3778 = vmatpush1.bf16.msra.mxu1 %v5331_v51  ;;  %3860 = vmatpush1.bf16.msra.mxu0 %v5334_v52 }
 0x792   : > { %3779 = vmatprep.subr.bf16.mxu1 %v5339_v53  ;;  %3861 = vmatprep.subr.bf16.mxu0 %v5342_v54  ;;  %v5391_v54 = vld [vmem:[%s6909_s20 + $0x2e0] ss:$16 sps:$4 sm:$0xff]  }
 0x795   : > { %3780 = vmatpush1.bf16.msra.mxu1 %v5337_v55  ;;  %3862 = vmatpush1.bf16.msra.mxu0 %v5340_v56  ;;  %v5394_v55 = vld [vmem:[%s6909_s20 + $0x2e8] ss:$16 sps:$4 sm:$0xff]   ;;  %v5399_v56 = vld [vmem:[%s6909_s20 + $0x304] ss:$16 sps:$4 sm:$0xff]  }
 0x796   : > { %3781 = vmatprep.subr.bf16.mxu1 %v5345_v57  ;;  %3863 = vmatprep.subr.bf16.mxu0 %v5348_v32  ;;  %v5402_v57 = vld [vmem:[%s6909_s20 + $0x30c] ss:$16 sps:$4 sm:$0xff]   ;;  %v5397_v32 = vld [vmem:[%s6909_s20 + $0x300] ss:$16 sps:$4 sm:$0xff]  }
 0x799   : > { %3782 = vmatpush1.bf16.msra.mxu1 %v5343_v58  ;;  %3864 = vmatpush1.bf16.msra.mxu0 %v5346_v59  ;;  %v5400_v58 = vld [vmem:[%s6909_s20 + $0x308] ss:$16 sps:$4 sm:$0xff]   ;;  %v5405_v59 = vld [vmem:[%s6909_s20 + $0x324] ss:$16 sps:$4 sm:$0xff]  }
 0x79a   : > { %3792 = vmatprep.subr.bf16.mxu1 %v5351_v60  ;;  %3874 = vmatprep.subr.bf16.mxu0 %v5354_v61  ;;  %v5408_v60 = vld [vmem:[%s6909_s20 + $0x32c] ss:$16 sps:$4 sm:$0xff]   ;;  %v5403_v61 = vld [vmem:[%s6909_s20 + $0x320] ss:$16 sps:$4 sm:$0xff]  }
 0x7f3   : > { %v2834_v62 = vpop.f32.mrb[52].mxu1 }
 0x7f4   : > { %v5011_v22 = vpop.f32.mrb[53].mxu1  ;;  %v2835_v2 = vadd.f32 %v2834_v62, %v2795_v1  ;;  %v5406_v62 = vld [vmem:[%s6909_s20 + $0x328] ss:$16 sps:$4 sm:$0xff]  }
 0x7f5   : > { %v2837_v63 = vpop.f32.mrb[54].mxu1  ;;  %v5411_v22 = vld [vmem:[%s6909_s20 + $0x344] ss:$16 sps:$4 sm:$0xff]  }
 0x7f6   : > { %v5012_v0 = vpop.f32.mrb[55].mxu1  ;;  %v2840_v6 = vmax.f32 %v2835_v2, 0.0  ;;  %v5414_v63 = vld [vmem:[%s6909_s20 + $0x34c] ss:$16 sps:$4 sm:$0xff]   ;;  %v5417_v2 = vld [vmem:[%s6909_s20 + $0x364] ss:$16 sps:$4 sm:$0xff]  }
 0x7f7   : > { %v5409_v0 = vld [vmem:[%s6909_s20 + $0x340] ss:$16 sps:$4 sm:$0xff]  }
 0x7f8   : > { %v2841_v13 = vpack.c.bf16 %v2840_v6, %v2840_v6  ;;  %v5423_v6 = vld [vmem:[%s6909_s20 + $0x384] ss:$16 sps:$4 sm:$0xff]  }
 0x813   : > { %v2881_v3 = vpop.f32.mrb[44].mxu0 }
 0x814   : > { %v2882_v4 = vadd.f32 %v2881_v3, %v2795_v1  ;;  %v5023_v5 = vpop.f32.mrb[45].mxu0  ;;  %v5420_v3 = vld [vmem:[%s6909_s20 + $0x36c] ss:$16 sps:$4 sm:$0xff]  }
 0x815   : > { %v2884_v7 = vpop.f32.mrb[46].mxu0  ;;  %v5418_v5 = vld [vmem:[%s6909_s20 + $0x368] ss:$16 sps:$4 sm:$0xff]  }
 0x816   : > { %v2887_v8 = vmax.f32 %v2882_v4, 0.0  ;;  %v5024_v9 = vpop.f32.mrb[47].mxu0  ;;  %v5415_v4 = vld [vmem:[%s6909_s20 + $0x360] ss:$16 sps:$4 sm:$0xff]   ;;  %v5426_v7 = vld [vmem:[%s6909_s20 + $0x38c] ss:$16 sps:$4 sm:$0xff]  }
 0x817   : > { %v5424_v9 = vld [vmem:[%s6909_s20 + $0x388] ss:$16 sps:$4 sm:$0xff]  }
 0x818   : > { %v2888_v10 = vpack.c.bf16 %v2887_v8, %v2887_v8  ;;  %v5421_v8 = vld [vmem:[%s6909_s20 + $0x380] ss:$16 sps:$4 sm:$0xff]  }
 0x81a   : > { %3783 = vmatprep.mubr.bf16.mxu1 %v2888_v10  ;;  %3865 = vmatprep.mubr.bf16.mxu0 %v2888_v10  ;;  %v5429_v10 = vld [vmem:[%s6909_s20 + $0x3a4] ss:$16 sps:$4 sm:$0xff]  }
 0x81b   : > { %3784 = vmatmul.mubr.bf16.vlgmr.msra.gmra.mrb[60].mxu1 %v2841_v13  ;;  %3866 = vmatmul.mubr.bf16.vlgmr.msra.gmra.mrb[52].mxu0 %v2841_v13  ;;  %v5430_v13 = vld [vmem:[%s6909_s20 + $0x3a8] ss:$16 sps:$4 sm:$0xff]  }
 0x81c   : > { %3793 = vmatpush1.bf16.msra.mxu1 %v5349_v11  ;;  %3875 = vmatpush1.bf16.msra.mxu0 %v5352_v12  ;;  %v5432_v11 = vld [vmem:[%s6909_s20 + $0x3ac] ss:$16 sps:$4 sm:$0xff]   ;;  %v5427_v12 = vld [vmem:[%s6909_s20 + $0x3a0] ss:$16 sps:$4 sm:$0xff]  }
 0x81d   : > { %3794 = vmatprep.subr.bf16.mxu1 %v5357_v14  ;;  %3876 = vmatprep.subr.bf16.mxu0 %v5360_v15  ;;  %v5435_v14 = vld [vmem:[%s6909_s20 + $0x3c4] ss:$16 sps:$4 sm:$0xff]   ;;  %v5438_v15 = vld [vmem:[%s6909_s20 + $0x3cc] ss:$16 sps:$4 sm:$0xff]  }
 0x820   : > { %3795 = vmatpush1.bf16.msra.mxu1 %v5355_v16  ;;  %3877 = vmatpush1.bf16.msra.mxu0 %v5358_v17  ;;  %v5433_v16 = vld [vmem:[%s6909_s20 + $0x3c0] ss:$16 sps:$4 sm:$0xff]   ;;  %v5436_v17 = vld [vmem:[%s6909_s20 + $0x3c8] ss:$16 sps:$4 sm:$0xff]  }
 0x821   : > { %3796 = vmatprep.subr.bf16.mxu1 %v5363_v18  ;;  %3878 = vmatprep.subr.bf16.mxu0 %v5366_v19  ;;  %v5441_v18 = vld [vmem:[%s6909_s20 + $0x3e4] ss:$16 sps:$4 sm:$0xff]   ;;  %v5444_v19 = vld [vmem:[%s6909_s20 + $0x3ec] ss:$16 sps:$4 sm:$0xff]  }
 0x824   : > { %3797 = vmatpush1.bf16.msra.mxu1 %v5361_v20  ;;  %3879 = vmatpush1.bf16.msra.mxu0 %v5364_v21  ;;  %v5439_v20 = vld [vmem:[%s6909_s20 + $0x3e0] ss:$16 sps:$4 sm:$0xff]   ;;  %v5442_v21 = vld [vmem:[%s6909_s20 + $0x3e8] ss:$16 sps:$4 sm:$0xff]  }
 0x825   : > { %3798 = vmatprep.subr.bf16.mxu1 %v5369_v23  ;;  %3880 = vmatprep.subr.bf16.mxu0 %v5372_v24 }
 0x828   : > { %3799 = vmatpush1.bf16.msra.mxu1 %v5367_v25  ;;  %3881 = vmatpush1.bf16.msra.mxu0 %v5370_v26 }
 0x829   : > { %3800 = vmatprep.subr.bf16.mxu1 %v5375_v27  ;;  %3882 = vmatprep.subr.bf16.mxu0 %v5378_v28 }
 0x82c   : > { %3801 = vmatpush1.bf16.msra.mxu1 %v5373_v29  ;;  %3883 = vmatpush1.bf16.msra.mxu0 %v5376_v30 }
 0x82d   : > { %3802 = vmatprep.subr.bf16.mxu1 %v5381_v31  ;;  %3884 = vmatprep.subr.bf16.mxu0 %v5384_v33 }
 0x82f   : > { %v2928_v38 = vpop.f32.mrb[56].mxu1  ;;  %v2975_v39 = vpop.f32.mrb[48].mxu0 }
 0x830   : > { %v6692_v40 = vadd.f32 %v2928_v38, %v2795_v1  ;;  %v2976_v41 = vadd.f32 %v2975_v39, %v2795_v1  ;;  %3803 = vmatpush1.bf16.msra.mxu1 %v5379_v34  ;;  %3885 = vmatpush1.bf16.msra.mxu0 %v5382_v35  ;;  %v5047_v44 = vpop.f32.mrb[49].mxu0  ;;  %v5035_v45 = vpop.f32.mrb[57].mxu1  ;;  %v5412_v1 = vld [vmem:[%s6909_s20 + $0x348] ss:$16 sps:$4 sm:$0xff]  }
 0x831   : > { %3804 = vmatprep.subr.bf16.mxu1 %v5387_v36  ;;  %3886 = vmatprep.subr.bf16.mxu0 %v5390_v37  ;;  %v2978_v48 = vpop.f32.mrb[50].mxu0  ;;  %v2931_v49 = vpop.f32.mrb[58].mxu1 }
 0x832   : > { %v2981_v50 = vmax.f32 %v2976_v41, 0.0  ;;  %v5048_v51 = vpop.f32.mrb[51].mxu0  ;;  %v5036_v52 = vpop.f32.mrb[59].mxu1  ;;  %v2934_v23 = vmax.f32 %v6692_v40, 0.0 }
 0x834   : > { %v2982_v53 = vpack.c.bf16 %v2981_v50, %v2981_v50  ;;  %3805 = vmatpush1.bf16.msra.mxu1 %v5385_v42  ;;  %3887 = vmatpush1.bf16.msra.mxu0 %v5388_v43  ;;  %v2935_v24 = vpack.c.bf16 %v2934_v23, %v2934_v23 }
 0x835   : > { %3806 = vmatprep.subr.bf16.mxu1 %v5393_v46  ;;  %3888 = vmatprep.subr.bf16.mxu0 %v5396_v47 }
 0x836   : > { %3824 = vmatprep.mubr.bf16.mxu1 %v2982_v53  ;;  %3906 = vmatprep.mubr.bf16.mxu0 %v2982_v53 }
 0x838   : > { %3807 = vmatpush1.bf16.msra.mxu1 %v5391_v54  ;;  %3889 = vmatpush1.bf16.msra.mxu0 %v5394_v55 }
 0x839   : > { %3808 = vmatprep.subr.bf16.mxu1 %v5399_v56  ;;  %3890 = vmatprep.subr.bf16.mxu0 %v5402_v57 }
 0x83c   : > { %3809 = vmatpush1.bf16.msra.mxu1 %v5397_v32  ;;  %3891 = vmatpush1.bf16.msra.mxu0 %v5400_v58 }
 0x83d   : > { %3810 = vmatprep.subr.bf16.mxu1 %v5405_v59  ;;  %3892 = vmatprep.subr.bf16.mxu0 %v5408_v60 }
 0x840   : > { %3811 = vmatpush1.bf16.msra.mxu1 %v5403_v61  ;;  %3893 = vmatpush1.bf16.msra.mxu0 %v5406_v62 }
 0x841   : > { %3812 = vmatprep.subr.bf16.mxu1 %v5411_v22  ;;  %3894 = vmatprep.subr.bf16.mxu0 %v5414_v63 }
 0x844   : > { %3813 = vmatpush1.bf16.msra.mxu1 %v5409_v0  ;;  %3895 = vmatpush1.bf16.msra.mxu0 %v5412_v1 }
 0x845   : > { %3814 = vmatprep.subr.bf16.mxu1 %v5417_v2  ;;  %3896 = vmatprep.subr.bf16.mxu0 %v5420_v3 }
 0x848   : > { %3815 = vmatpush1.bf16.msra.mxu1 %v5415_v4  ;;  %3897 = vmatpush1.bf16.msra.mxu0 %v5418_v5 }
 0x849   : > { %3816 = vmatprep.subr.bf16.mxu1 %v5423_v6  ;;  %3898 = vmatprep.subr.bf16.mxu0 %v5426_v7 }
 0x84c   : > { %3817 = vmatpush1.bf16.msra.mxu1 %v5421_v8  ;;  %3899 = vmatpush1.bf16.msra.mxu0 %v5424_v9 }
 0x84d   : > { %3818 = vmatprep.subr.bf16.mxu1 %v5429_v10  ;;  %3900 = vmatprep.subr.bf16.mxu0 %v5432_v11 }
 0x850   : > { %3819 = vmatpush1.bf16.msra.mxu1 %v5427_v12  ;;  %3901 = vmatpush1.bf16.msra.mxu0 %v5430_v13 }
 0x851   : > { %3820 = vmatprep.subr.bf16.mxu1 %v5435_v14  ;;  %3902 = vmatprep.subr.bf16.mxu0 %v5438_v15 }
 0x854   : > { %3821 = vmatpush1.bf16.msra.mxu1 %v5433_v16  ;;  %3903 = vmatpush1.bf16.msra.mxu0 %v5436_v17 }
 0x855   : > { %3822 = vmatprep.subr.bf16.mxu1 %v5441_v18  ;;  %3904 = vmatprep.subr.bf16.mxu0 %v5444_v19 }
 0x858   : > { %3823 = vmatpush1.bf16.msra.mxu1 %v5439_v20  ;;  %3905 = vmatpush1.bf16.msra.mxu0 %v5442_v21 }
 0x85b   : > { %3825 = vmatmul.mubr.bf16.vlgmr.msra.gmra.mrb[60].mxu1 %v2935_v24  ;;  %3907 = vmatmul.mubr.bf16.vlgmr.msra.gmra.mrb[52].mxu0 %v2935_v24 }
 0x92b   : > { %3925 = sbr.rel (!%p6911_p12) target bundleno = 2361 (0x939), region = 104 }
 0x92e   : > { %v3826_v25 = vpop.f32.mrb[60].mxu1  ;;  %v3908_v26 = vpop.f32.mrb[52].mxu0 }
 0x92f   : > { %3915 = vst [vmem:[%s715_s24] sm:$0xff] %v3826_v25  ;;  %3917 = vst [vmem:[%s715_s24 + $0x10] sm:$0xff] %v3908_v26  ;;  %v3828_v27 = vpop.f32.mrb[61].mxu1  ;;  %v3910_v28 = vpop.f32.mrb[53].mxu0 }
 0x930   : > { %3916 = vst [vmem:[%s715_s24 + $0x8] sm:$0xff] %v3828_v27  ;;  %3918 = vst [vmem:[%s715_s24 + $0x18] sm:$0xff] %v3910_v28  ;;  %v3830_v29 = vpop.f32.mrb[62].mxu1  ;;  %v3912_v30 = vpop.f32.mrb[54].mxu0 }
 0x931   : > { %v3831_v31 = vpop.f32.mrb[63].mxu1  ;;  %v3913_v33 = vpop.f32.mrb[55].mxu0 }
 0x936   : > { %v3941_v34 = vld [vmem:[%s715_s24] sm:$0xff]  ;;  %v3945_v36 = vld [vmem:[%s715_s24 + $0x10] sm:$0xff] }
 0x937   : > { %v3943_v35 = vld [vmem:[%s715_s24 + $0x8] sm:$0xff]  ;;  %v3947_v37 = vld [vmem:[%s715_s24 + $0x18] sm:$0xff]  ;;  %3942 = vst [vmem:[%s3928_s1] sm:$0xff] %v3941_v34  ;;  %3946 = vst [vmem:[%s3928_s1 + $0x30] sm:$0xff] %v3945_v36 }
 0x938   : > { %3944 = vst [vmem:[%s3928_s1 + $0x8] sm:$0xff] %v3943_v35  ;;  %3948 = vst [vmem:[%s3928_s1 + $0x38] sm:$0xff] %v3947_v37 }
 0x939 PF: > { %s6913_s16 = sld [smem:[#allocation19_spill]]  ;;  %s6914_s14 = sld [smem:[#allocation18_spill]] }
 0x93a   : > { %s6915_s15 = sld [smem:[#allocation20_spill]]  ;;  %s6916_s29 = smov %s5663_s30 }
 0x93f   : > { %p31_p8 = scmp.ge.s32.totalorder %s6913_s16, 5   ;;  %s6917_s30 = smov %s6914_s14 }
 0x941   :  { %33 = sbr.rel (!%p31_p8) target bundleno = 17 (0x11), region = 222 }
 0x948   :  { %3964 = vsyncpa [#allocation3], 1 }
 0x949   :  { %3966 = vsyncpa [#allocation3 + $0x1], 1 }
 0x94a   :  { %3967 = vsyncpa [#allocation5], 1 }
 0x94b   :  { %3969 = vsyncpa [#allocation5 + $0x1], 1 }
 0x94c   :  { %3970 = vsyncpa [#allocation8], 1 }
 0x94d   :  { %3972 = vsyncpa [#allocation8 + $0x1], 1 }
 0x94e   :  { %3973 = vsyncpa [#allocation11], 1 }

</bundles_post_ra>
